<compile_context>
chip_gen: v7x
topology: tpu7x:2x2x1
jax: 0.10.0
libtpu: 0.0.40
codegen_flags: <defaults>
</compile_context>

<pallas_src>
from functools import partial

import jax
import jax.numpy as jnp
from jax.experimental import pallas as pl
from jax.experimental.pallas import tpu as pltpu


def _coordconv_kernel(xf_ref, w_ref, b_ref, o_ref, patch_ref, *,
                      Bt, Hout, Wout, Wrow, KH, KW, Cin, Cout, relu):
    """One batch-tile (Bt images) per grid step.

    xf_ref    : (Bt, Cin, Lf)            padded, spatially-flattened NCHW input, bf16
    w_ref     : (Cout, KH*KW*Cin)        conv weights, tap-major (kh, kw, ci), bf16
    b_ref     : (Cout, 1)                bias, f32
    o_ref     : (Bt, Cout, Hout*Wout)    NCHW-flat output block, f32
    patch_ref : (KH*KW*Cin, Bt*Hout*Wrow) im2col patch, flat M on lanes, bf16
    """
    Mw = Hout * Wrow   # "wide" rows: valid prefix Wout, (KW-1) junk columns

    # im2col staging: one contiguous, lane-dense slice copy per (image, tap).
    for b in range(Bt):
        for kh in range(KH):
            for kw in range(KW):
                t = kh * KW + kw
                s = kh * Wrow + kw
                patch_ref[t * Cin:(t + 1) * Cin, b * Mw:(b + 1) * Mw] = (
                    xf_ref[b, :, s:s + Mw])

    # Single fused matmul on the MXU: (Cout, K) x (K, Bt*Mw) -> (Cout, Bt*Mw),
    # f32 accumulation.
    acc = jnp.dot(w_ref[...], patch_ref[...],
                  preferred_element_type=jnp.float32)
    acc = acc + b_ref[...]
    if relu:
        acc = jnp.maximum(acc, 0.0)

    # Crop each wide row to its valid prefix and store NCHW-flat (no transpose).
    # TODO(synk): switch to a fori_loop + pl.ds variant for very tall images to
    #             bound unrolled code size.
    for b in range(Bt):
        for h in range(Hout):
            src = b * Mw + h * Wrow
            o_ref[b, :, h * Wout:(h + 1) * Wout] = (
                acc[:, src:src + Wout].astype(o_ref.dtype))


def coordconv2d_forward(x, coords, weight, bias, *, stride=1, padding='same',
                        activation='relu', compute_dtype=jnp.bfloat16):
    """JAX/Pallas equivalent of CoordConv2D.forward((x, coords)).

    x      : [B, Cimg,   H, W] float32 (NCHW)
    coords : [B, Ccoord, H, W] float32 (NCHW)
    weight : [Cout, Cimg+Ccoord, KH, KW] (PyTorch OIHW)
    bias   : [Cout]
    returns (out [B, Cout, Hout, Wout], coords_out)
    """
    # PyTorch's Conv2d with padding='same' requires stride == 1.
    assert stride == 1, "Pallas conv path implemented for stride=1"
    if activation not in (None, 'relu'):
        raise NotImplementedError(f'activation {activation!r} not implemented')

    B, Cimg, H, W = x.shape
    Ccoord = coords.shape[1]
    Cin = Cimg + Ccoord
    Cout, Cin_w, KH, KW = weight.shape
    assert Cin_w == Cin

    if padding == 'same':
        ph0, ph1 = (KH - 1) // 2, KH // 2
        pw0, pw1 = (KW - 1) // 2, KW // 2
        Hout, Wout = H, W
    elif padding == 'valid':
        ph0 = ph1 = pw0 = pw1 = 0
        Hout, Wout = H - KH + 1, W - KW + 1
    else:
        raise NotImplementedError(f"padding {padding!r} not implemented")

    Wrow = W + pw0 + pw1          # padded row width == wide-output row stride
    Hrows = H + ph0 + ph1 + 1     # +1 zero safety row for the last tap shifts
    Lf = Hrows * Wrow
    Mw = Hout * Wrow
    Kdim = KH * KW * Cin
    HWo = Hout * Wout

    # Single fused HBM pass over the input: channel concat + spatial zero pad +
    # bf16 cast; the flatten to (B, Cin, Hrows*Wrow) is free (metadata only).
    # TODO(synk): bf16 compute also rounds the coordinate channels; keep a
    #             mixed-precision path if f32 coord fidelity is required.
    # TODO(synk): fold the concat+pad+cast pass into the kernel (separate x /
    #             coords inputs + in-kernel zero handling) to reach pure
    #             read-once/write-once HBM traffic.
    xin = jnp.concatenate([x, coords], axis=1).astype(compute_dtype)
    xpad = jnp.pad(xin, ((0, 0), (0, 0), (ph0, ph1 + 1), (pw0, pw1)))
    xf = xpad.reshape(B, Cin, Lf)

    # Weights tap-major (kh, kw, ci) to match the patch row order; bias f32.
    w_mat = (jnp.transpose(weight, (0, 2, 3, 1))
             .reshape(Cout, Kdim).astype(compute_dtype))
    b_col = bias.reshape(Cout, 1).astype(jnp.float32)

    # Batch-tile: fold images into the flat matmul M dim until M >= ~4096 to
    # amortize per-grid-step overhead, under a patch-VMEM budget.  No ">= 2
    # grid steps" clamp (single-TC chips don't benefit); remaining grid steps
    # are "parallel" so v7x's two TensorCores split the batch.
    kdim_pad = -(-Kdim // 16) * 16
    patch_budget = 12 * 2 ** 20
    Bt = 1
    for d in range(1, B + 1):
        if B % d:
            continue
        if d > 1 and kdim_pad * d * Mw * 2 > patch_budget:
            break
        Bt = d
        if d * Mw >= 4096:
            break
    nb = B // Bt

    # Explicit VMEM budget (default scoped limit is only 16-32 MiB).
    def rup(a, m):
        return -(-a // m) * m

    est = (2 * Bt * rup(Cin, 16) * rup(Lf, 128) * 2          # input, double-buffered
           + 2 * Bt * rup(Cout, 8) * rup(HWo, 128) * 4       # output, double-buffered
           + kdim_pad * rup(Bt * Mw, 128) * 2                # im2col patch scratch
           + 3 * rup(Cout, 8) * rup(Bt * Mw, 128) * 4        # f32 acc temporaries
           + (1 << 20))
    vmem_limit = int(min(max(2 * est, 32 * 2 ** 20), 64 * 2 ** 20))
    # TODO(synk): for images where one batch-tile exceeds ~64 MiB (v7x), add a
    #             halo row-tiling grid axis instead of relying on more VMEM;
    #             on v7x a tap-accumulate (no-patch) variant is also preferable.

    relu = (activation == 'relu')
    kern = partial(_coordconv_kernel, Bt=Bt, Hout=Hout, Wout=Wout, Wrow=Wrow,
                   KH=KH, KW=KW, Cin=Cin, Cout=Cout, relu=relu)

    flops = 2 * B * HWo * Kdim * Cout
    bytes_accessed = (xf.size * xf.dtype.itemsize
                      + w_mat.size * w_mat.dtype.itemsize
                      + b_col.size * 4
                      + B * Cout * HWo * 4)

    out_flat = pl.pallas_call(
        kern,
        out_shape=jax.ShapeDtypeStruct((B, Cout, HWo), jnp.float32),
        grid=(nb,),
        in_specs=[
            pl.BlockSpec((Bt, Cin, Lf), lambda i: (i, 0, 0)),
            pl.BlockSpec((Cout, Kdim), lambda i: (0, 0)),
            pl.BlockSpec((Cout, 1), lambda i: (0, 0)),
        ],
        out_specs=pl.BlockSpec((Bt, Cout, HWo), lambda i: (i, 0, 0)),
        scratch_shapes=[pltpu.VMEM((Kdim, Bt * Mw), compute_dtype)],
        compiler_params=pltpu.CompilerParams(
            dimension_semantics=("parallel",),
            vmem_limit_bytes=vmem_limit),
        cost_estimate=pl.CostEstimate(flops=flops, transcendentals=0,
                                      bytes_accessed=bytes_accessed),
    )(xf, w_mat, b_col)

    # Already NCHW; this reshape is metadata-only (no extra HBM pass).
    out = out_flat.reshape(B, Cout, Hout, Wout)

    # Coordinate tensor pass-through / downsample (module's exact rules).
    if padding == 'same' and stride > 1:
        coords_out = coords[..., ::stride, ::stride]
    elif padding == 'valid':
        # TODO(synk): module uses self.ksize[0]; square kernel assumed here.
        i0 = KH // 2
        if i0 > 0:
            coords_out = coords[..., i0:-i0:stride, i0:-i0:stride]
        else:
            coords_out = coords[..., ::stride, ::stride]
    else:
        coords_out = coords
    return out, coords_out


if __name__ == "__main__":
    # Small deterministic inputs consistent with the module's forward.
    B, Cimg, Ccoord, H, Wd = 2, 4, 2, 16, 16
    Cout, K = 8, 3
    Cin = Cimg + Ccoord

    kx, kc = jax.random.split(jax.random.PRNGKey(0))
    x = jax.random.normal(kx, (B, Cimg, H, Wd), jnp.float32)
    coords = jax.random.normal(kc, (B, Ccoord, H, Wd), jnp.float32)

    # Deterministic synthetic parameters (Conv2d(Cin, Cout, K) shapes).
    wkey, bkey = jax.random.split(jax.random.PRNGKey(42))
    fan_in = Cin * K * K
    bound = 1.0 / (fan_in ** 0.5)
    weight = jax.random.uniform(wkey, (Cout, Cin, K, K), jnp.float32, -bound, bound)
    bias = jax.random.uniform(bkey, (Cout,), jnp.float32, -bound, bound)

    fwd = jax.jit(lambda a, c, w, bb: coordconv2d_forward(
        a, c, w, bb, stride=1, padding='same', activation='relu'))
    out, coords_out = fwd(x, coords, weight, bias)
    out = jax.block_until_ready(out)
    coords_out = jax.block_until_ready(coords_out)

    # Cross-check against XLA's conv with the SAME bf16-rounded operands and
    # f32 accumulation (isolates conv+bias+relu semantics from the declared
    # bf16 compute-dtype choice).
    x_r = x.astype(jnp.bfloat16).astype(jnp.float32)
    c_r = coords.astype(jnp.bfloat16).astype(jnp.float32)
    w_r = weight.astype(jnp.bfloat16).astype(jnp.float32)
    xin = jnp.concatenate([x_r, c_r], axis=1)
    ref = jax.lax.conv_general_dilated(
        xin, w_r, window_strides=(1, 1), padding='SAME',
        dimension_numbers=('NCHW', 'OIHW', 'NCHW'))
    ref = jnp.maximum(ref + bias[None, :, None, None], 0.0)

    assert out.shape == (B, Cout, H, Wd)
    assert coords_out.shape == coords.shape
    err = float(jnp.max(jnp.abs(out - ref)))
    assert jnp.allclose(out, ref, atol=2e-3, rtol=2e-3), err
    assert jnp.allclose(coords_out, coords)
    print("KERNEL_OK")
</pallas_src>

<mosaic_0001>
module attributes {stable_mosaic.version = 11 : i64} {
  func.func @_coordconv_kernel(%arg0: i32, %arg1: memref<2x6x342xbf16, #tpu.memory_space<vmem>>, %arg2: memref<8x54xbf16, #tpu.memory_space<vmem>>, %arg3: memref<8x1xf32, #tpu.memory_space<vmem>>, %arg4: memref<2x8x256xf32, #tpu.memory_space<vmem>>, %arg5: memref<54x576xbf16, #tpu.memory_space<vmem>>) attributes {dimension_semantics = [#tpu.dimension_semantics<parallel>], iteration_bounds = array<i64: 1>, scalar_prefetch = 0 : i64, scratch_operands = 1 : i64, tpu.core_type = #tpu.core_type<tc>, window_params = [{transform_indices = @transform_0, window_bounds = array<i64: 2, 6, 342>}, {pipeline_mode = #tpu.pipeline_mode<synchronous>, transform_indices = @transform_1, window_bounds = array<i64: 8, 54>}, {pipeline_mode = #tpu.pipeline_mode<synchronous>, transform_indices = @transform_2, window_bounds = array<i64: 8, 1>}, {transform_indices = @transform_3, window_bounds = array<i64: 2, 8, 256>}]} {
    %c0 = arith.constant 0 : index
    %c0_0 = arith.constant 0 : index
    %c0_1 = arith.constant 0 : index
    %0 = vector.load %arg1[%c0, %c0_0, %c0_1] : memref<2x6x342xbf16, #tpu.memory_space<vmem>>, vector<1x6x288xbf16>
    %1 = vector.shape_cast %0 : vector<1x6x288xbf16> to vector<6x288xbf16>
    %c0_2 = arith.constant 0 : index
    %c0_3 = arith.constant 0 : index
    %2 = vector.load %arg5[%c0_2, %c0_3] : memref<54x576xbf16, #tpu.memory_space<vmem>>, vector<6x288xbf16>
    tpu.vector_store %arg5[%c0_2, %c0_3], %1 {strides = array<i32>} : memref<54x576xbf16, #tpu.memory_space<vmem>>, vector<6x288xbf16>,
    %c0_4 = arith.constant 0 : index
    %c0_5 = arith.constant 0 : index
    %c1 = arith.constant 1 : index
    %3 = vector.load %arg1[%c0_4, %c0_5, %c1] : memref<2x6x342xbf16, #tpu.memory_space<vmem>>, vector<1x6x288xbf16>
    %4 = vector.shape_cast %3 : vector<1x6x288xbf16> to vector<6x288xbf16>
    %c6 = arith.constant 6 : index
    %c0_6 = arith.constant 0 : index
    %5 = vector.load %arg5[%c6, %c0_6] : memref<54x576xbf16, #tpu.memory_space<vmem>>, vector<6x288xbf16>
    tpu.vector_store %arg5[%c6, %c0_6], %4 {strides = array<i32>} : memref<54x576xbf16, #tpu.memory_space<vmem>>, vector<6x288xbf16>,
    %c0_7 = arith.constant 0 : index
    %c0_8 = arith.constant 0 : index
    %c2 = arith.constant 2 : index
    %6 = vector.load %arg1[%c0_7, %c0_8, %c2] : memref<2x6x342xbf16, #tpu.memory_space<vmem>>, vector<1x6x288xbf16>
    %7 = vector.shape_cast %6 : vector<1x6x288xbf16> to vector<6x288xbf16>
    %c12 = arith.constant 12 : index
    %c0_9 = arith.constant 0 : index
    %8 = vector.load %arg5[%c12, %c0_9] : memref<54x576xbf16, #tpu.memory_space<vmem>>, vector<6x288xbf16>
    tpu.vector_store %arg5[%c12, %c0_9], %7 {strides = array<i32>} : memref<54x576xbf16, #tpu.memory_space<vmem>>, vector<6x288xbf16>,
    %c0_10 = arith.constant 0 : index
    %c0_11 = arith.constant 0 : index
    %c18 = arith.constant 18 : index
    %9 = vector.load %arg1[%c0_10, %c0_11, %c18] : memref<2x6x342xbf16, #tpu.memory_space<vmem>>, vector<1x6x288xbf16>
    %10 = vector.shape_cast %9 : vector<1x6x288xbf16> to vector<6x288xbf16>
    %c18_12 = arith.constant 18 : index
    %c0_13 = arith.constant 0 : index
    %11 = vector.load %arg5[%c18_12, %c0_13] : memref<54x576xbf16, #tpu.memory_space<vmem>>, vector<6x288xbf16>
    tpu.vector_store %arg5[%c18_12, %c0_13], %10 {strides = array<i32>} : memref<54x576xbf16, #tpu.memory_space<vmem>>, vector<6x288xbf16>,
    %c0_14 = arith.constant 0 : index
    %c0_15 = arith.constant 0 : index
    %c19 = arith.constant 19 : index
    %12 = vector.load %arg1[%c0_14, %c0_15, %c19] : memref<2x6x342xbf16, #tpu.memory_space<vmem>>, vector<1x6x288xbf16>
    %13 = vector.shape_cast %12 : vector<1x6x288xbf16> to vector<6x288xbf16>
    %c24 = arith.constant 24 : index
    %c0_16 = arith.constant 0 : index
    %14 = vector.load %arg5[%c24, %c0_16] : memref<54x576xbf16, #tpu.memory_space<vmem>>, vector<6x288xbf16>
    tpu.vector_store %arg5[%c24, %c0_16], %13 {strides = array<i32>} : memref<54x576xbf16, #tpu.memory_space<vmem>>, vector<6x288xbf16>,
    %c0_17 = arith.constant 0 : index
    %c0_18 = arith.constant 0 : index
    %c20 = arith.constant 20 : index
    %15 = vector.load %arg1[%c0_17, %c0_18, %c20] : memref<2x6x342xbf16, #tpu.memory_space<vmem>>, vector<1x6x288xbf16>
    %16 = vector.shape_cast %15 : vector<1x6x288xbf16> to vector<6x288xbf16>
    %c30 = arith.constant 30 : index
    %c0_19 = arith.constant 0 : index
    %17 = vector.load %arg5[%c30, %c0_19] : memref<54x576xbf16, #tpu.memory_space<vmem>>, vector<6x288xbf16>
    tpu.vector_store %arg5[%c30, %c0_19], %16 {strides = array<i32>} : memref<54x576xbf16, #tpu.memory_space<vmem>>, vector<6x288xbf16>,
    %c0_20 = arith.constant 0 : index
    %c0_21 = arith.constant 0 : index
    %c36 = arith.constant 36 : index
    %18 = vector.load %arg1[%c0_20, %c0_21, %c36] : memref<2x6x342xbf16, #tpu.memory_space<vmem>>, vector<1x6x288xbf16>
    %19 = vector.shape_cast %18 : vector<1x6x288xbf16> to vector<6x288xbf16>
    %c36_22 = arith.constant 36 : index
    %c0_23 = arith.constant 0 : index
    %20 = vector.load %arg5[%c36_22, %c0_23] : memref<54x576xbf16, #tpu.memory_space<vmem>>, vector<6x288xbf16>
    tpu.vector_store %arg5[%c36_22, %c0_23], %19 {strides = array<i32>} : memref<54x576xbf16, #tpu.memory_space<vmem>>, vector<6x288xbf16>,
    %c0_24 = arith.constant 0 : index
    %c0_25 = arith.constant 0 : index
    %c37 = arith.constant 37 : index
    %21 = vector.load %arg1[%c0_24, %c0_25, %c37] : memref<2x6x342xbf16, #tpu.memory_space<vmem>>, vector<1x6x288xbf16>
    %22 = vector.shape_cast %21 : vector<1x6x288xbf16> to vector<6x288xbf16>
    %c42 = arith.constant 42 : index
    %c0_26 = arith.constant 0 : index
    %23 = vector.load %arg5[%c42, %c0_26] : memref<54x576xbf16, #tpu.memory_space<vmem>>, vector<6x288xbf16>
    tpu.vector_store %arg5[%c42, %c0_26], %22 {strides = array<i32>} : memref<54x576xbf16, #tpu.memory_space<vmem>>, vector<6x288xbf16>,
    %c0_27 = arith.constant 0 : index
    %c0_28 = arith.constant 0 : index
    %c38 = arith.constant 38 : index
    %24 = vector.load %arg1[%c0_27, %c0_28, %c38] : memref<2x6x342xbf16, #tpu.memory_space<vmem>>, vector<1x6x288xbf16>
    %25 = vector.shape_cast %24 : vector<1x6x288xbf16> to vector<6x288xbf16>
    %c48 = arith.constant 48 : index
    %c0_29 = arith.constant 0 : index
    %26 = vector.load %arg5[%c48, %c0_29] : memref<54x576xbf16, #tpu.memory_space<vmem>>, vector<6x288xbf16>
    tpu.vector_store %arg5[%c48, %c0_29], %25 {strides = array<i32>} : memref<54x576xbf16, #tpu.memory_space<vmem>>, vector<6x288xbf16>,
    %c1_30 = arith.constant 1 : index
    %c0_31 = arith.constant 0 : index
    %c0_32 = arith.constant 0 : index
    %27 = vector.load %arg1[%c1_30, %c0_31, %c0_32] : memref<2x6x342xbf16, #tpu.memory_space<vmem>>, vector<1x6x288xbf16>
    %28 = vector.shape_cast %27 : vector<1x6x288xbf16> to vector<6x288xbf16>
    %c0_33 = arith.constant 0 : index
    %c288 = arith.constant 288 : index
    %29 = vector.load %arg5[%c0_33, %c288] : memref<54x576xbf16, #tpu.memory_space<vmem>>, vector<6x288xbf16>
    tpu.vector_store %arg5[%c0_33, %c288], %28 {strides = array<i32>} : memref<54x576xbf16, #tpu.memory_space<vmem>>, vector<6x288xbf16>,
    %c1_34 = arith.constant 1 : index
    %c0_35 = arith.constant 0 : index
    %c1_36 = arith.constant 1 : index
    %30 = vector.load %arg1[%c1_34, %c0_35, %c1_36] : memref<2x6x342xbf16, #tpu.memory_space<vmem>>, vector<1x6x288xbf16>
    %31 = vector.shape_cast %30 : vector<1x6x288xbf16> to vector<6x288xbf16>
    %c6_37 = arith.constant 6 : index
    %c288_38 = arith.constant 288 : index
    %32 = vector.load %arg5[%c6_37, %c288_38] : memref<54x576xbf16, #tpu.memory_space<vmem>>, vector<6x288xbf16>
    tpu.vector_store %arg5[%c6_37, %c288_38], %31 {strides = array<i32>} : memref<54x576xbf16, #tpu.memory_space<vmem>>, vector<6x288xbf16>,
    %c1_39 = arith.constant 1 : index
    %c0_40 = arith.constant 0 : index
    %c2_41 = arith.constant 2 : index
    %33 = vector.load %arg1[%c1_39, %c0_40, %c2_41] : memref<2x6x342xbf16, #tpu.memory_space<vmem>>, vector<1x6x288xbf16>
    %34 = vector.shape_cast %33 : vector<1x6x288xbf16> to vector<6x288xbf16>
    %c12_42 = arith.constant 12 : index
    %c288_43 = arith.constant 288 : index
    %35 = vector.load %arg5[%c12_42, %c288_43] : memref<54x576xbf16, #tpu.memory_space<vmem>>, vector<6x288xbf16>
    tpu.vector_store %arg5[%c12_42, %c288_43], %34 {strides = array<i32>} : memref<54x576xbf16, #tpu.memory_space<vmem>>, vector<6x288xbf16>,
    %c1_44 = arith.constant 1 : index
    %c0_45 = arith.constant 0 : index
    %c18_46 = arith.constant 18 : index
    %36 = vector.load %arg1[%c1_44, %c0_45, %c18_46] : memref<2x6x342xbf16, #tpu.memory_space<vmem>>, vector<1x6x288xbf16>
    %37 = vector.shape_cast %36 : vector<1x6x288xbf16> to vector<6x288xbf16>
    %c18_47 = arith.constant 18 : index
    %c288_48 = arith.constant 288 : index
    %38 = vector.load %arg5[%c18_47, %c288_48] : memref<54x576xbf16, #tpu.memory_space<vmem>>, vector<6x288xbf16>
    tpu.vector_store %arg5[%c18_47, %c288_48], %37 {strides = array<i32>} : memref<54x576xbf16, #tpu.memory_space<vmem>>, vector<6x288xbf16>,
    %c1_49 = arith.constant 1 : index
    %c0_50 = arith.constant 0 : index
    %c19_51 = arith.constant 19 : index
    %39 = vector.load %arg1[%c1_49, %c0_50, %c19_51] : memref<2x6x342xbf16, #tpu.memory_space<vmem>>, vector<1x6x288xbf16>
    %40 = vector.shape_cast %39 : vector<1x6x288xbf16> to vector<6x288xbf16>
    %c24_52 = arith.constant 24 : index
    %c288_53 = arith.constant 288 : index
    %41 = vector.load %arg5[%c24_52, %c288_53] : memref<54x576xbf16, #tpu.memory_space<vmem>>, vector<6x288xbf16>
    tpu.vector_store %arg5[%c24_52, %c288_53], %40 {strides = array<i32>} : memref<54x576xbf16, #tpu.memory_space<vmem>>, vector<6x288xbf16>,
    %c1_54 = arith.constant 1 : index
    %c0_55 = arith.constant 0 : index
    %c20_56 = arith.constant 20 : index
    %42 = vector.load %arg1[%c1_54, %c0_55, %c20_56] : memref<2x6x342xbf16, #tpu.memory_space<vmem>>, vector<1x6x288xbf16>
    %43 = vector.shape_cast %42 : vector<1x6x288xbf16> to vector<6x288xbf16>
    %c30_57 = arith.constant 30 : index
    %c288_58 = arith.constant 288 : index
    %44 = vector.load %arg5[%c30_57, %c288_58] : memref<54x576xbf16, #tpu.memory_space<vmem>>, vector<6x288xbf16>
    tpu.vector_store %arg5[%c30_57, %c288_58], %43 {strides = array<i32>} : memref<54x576xbf16, #tpu.memory_space<vmem>>, vector<6x288xbf16>,
    %c1_59 = arith.constant 1 : index
    %c0_60 = arith.constant 0 : index
    %c36_61 = arith.constant 36 : index
    %45 = vector.load %arg1[%c1_59, %c0_60, %c36_61] : memref<2x6x342xbf16, #tpu.memory_space<vmem>>, vector<1x6x288xbf16>
    %46 = vector.shape_cast %45 : vector<1x6x288xbf16> to vector<6x288xbf16>
    %c36_62 = arith.constant 36 : index
    %c288_63 = arith.constant 288 : index
    %47 = vector.load %arg5[%c36_62, %c288_63] : memref<54x576xbf16, #tpu.memory_space<vmem>>, vector<6x288xbf16>
    tpu.vector_store %arg5[%c36_62, %c288_63], %46 {strides = array<i32>} : memref<54x576xbf16, #tpu.memory_space<vmem>>, vector<6x288xbf16>,
    %c1_64 = arith.constant 1 : index
    %c0_65 = arith.constant 0 : index
    %c37_66 = arith.constant 37 : index
    %48 = vector.load %arg1[%c1_64, %c0_65, %c37_66] : memref<2x6x342xbf16, #tpu.memory_space<vmem>>, vector<1x6x288xbf16>
    %49 = vector.shape_cast %48 : vector<1x6x288xbf16> to vector<6x288xbf16>
    %c42_67 = arith.constant 42 : index
    %c288_68 = arith.constant 288 : index
    %50 = vector.load %arg5[%c42_67, %c288_68] : memref<54x576xbf16, #tpu.memory_space<vmem>>, vector<6x288xbf16>
    tpu.vector_store %arg5[%c42_67, %c288_68], %49 {strides = array<i32>} : memref<54x576xbf16, #tpu.memory_space<vmem>>, vector<6x288xbf16>,
    %c1_69 = arith.constant 1 : index
    %c0_70 = arith.constant 0 : index
    %c38_71 = arith.constant 38 : index
    %51 = vector.load %arg1[%c1_69, %c0_70, %c38_71] : memref<2x6x342xbf16, #tpu.memory_space<vmem>>, vector<1x6x288xbf16>
    %52 = vector.shape_cast %51 : vector<1x6x288xbf16> to vector<6x288xbf16>
    %c48_72 = arith.constant 48 : index
    %c288_73 = arith.constant 288 : index
    %53 = vector.load %arg5[%c48_72, %c288_73] : memref<54x576xbf16, #tpu.memory_space<vmem>>, vector<6x288xbf16>
    tpu.vector_store %arg5[%c48_72, %c288_73], %52 {strides = array<i32>} : memref<54x576xbf16, #tpu.memory_space<vmem>>, vector<6x288xbf16>,
    %c0_74 = arith.constant 0 : index
    %c0_75 = arith.constant 0 : index
    %54 = vector.load %arg2[%c0_74, %c0_75] : memref<8x54xbf16, #tpu.memory_space<vmem>>, vector<8x54xbf16>
    %c0_76 = arith.constant 0 : index
    %c0_77 = arith.constant 0 : index
    %55 = vector.load %arg5[%c0_76, %c0_77] : memref<54x576xbf16, #tpu.memory_space<vmem>>, vector<54x576xbf16>
    %cst = arith.constant dense<0.000000e+00> : vector<8x576xf32>
    %56 = tpu.matmul %54, %55, %cst {dimension_numbers = #tpu.dot_dimension_numbers<[1], [0], [0], [1], [0, 0, 1, 1], [], []>} : vector<8x54xbf16>, vector<54x576xbf16>, vector<8x576xf32> -> vector<8x576xf32>
    %c0_78 = arith.constant 0 : index
    %c0_79 = arith.constant 0 : index
    %57 = vector.load %arg3[%c0_78, %c0_79] : memref<8x1xf32, #tpu.memory_space<vmem>>, vector<8x1xf32>
    %58 = vector.broadcast %57 : vector<8x1xf32> to vector<8x576xf32>
    %59 = arith.addf %56, %58 : vector<8x576xf32>
    %cst_80 = arith.constant 0.000000e+00 : f32
    %60 = vector.broadcast %cst_80 : f32 to vector<8x576xf32>
    %61 = arith.maximumf %59, %60 : vector<8x576xf32>
    %62 = vector.extract_strided_slice %61 {offsets = [0, 0], sizes = [8, 16], strides = [1, 1]} : vector<8x576xf32> to vector<8x16xf32>
    %c0_81 = arith.constant 0 : index
    %c0_82 = arith.constant 0 : index
    %c0_83 = arith.constant 0 : index
    %63 = vector.load %arg4[%c0_81, %c0_82, %c0_83] : memref<2x8x256xf32, #tpu.memory_space<vmem>>, vector<1x8x16xf32>
    %64 = vector.shape_cast %63 : vector<1x8x16xf32> to vector<8x16xf32>
    %65 = vector.shape_cast %62 : vector<8x16xf32> to vector<1x8x16xf32>
    tpu.vector_store %arg4[%c0_81, %c0_82, %c0_83], %65 {strides = array<i32>} : memref<2x8x256xf32, #tpu.memory_space<vmem>>, vector<1x8x16xf32>,
    %66 = vector.extract_strided_slice %61 {offsets = [0, 18], sizes = [8, 16], strides = [1, 1]} : vector<8x576xf32> to vector<8x16xf32>
    %c0_84 = arith.constant 0 : index
    %c0_85 = arith.constant 0 : index
    %c16 = arith.constant 16 : index
    %67 = vector.load %arg4[%c0_84, %c0_85, %c16] : memref<2x8x256xf32, #tpu.memory_space<vmem>>, vector<1x8x16xf32>
    %68 = vector.shape_cast %67 : vector<1x8x16xf32> to vector<8x16xf32>
    %69 = vector.shape_cast %66 : vector<8x16xf32> to vector<1x8x16xf32>
    tpu.vector_store %arg4[%c0_84, %c0_85, %c16], %69 {strides = array<i32>} : memref<2x8x256xf32, #tpu.memory_space<vmem>>, vector<1x8x16xf32>,
    %70 = vector.extract_strided_slice %61 {offsets = [0, 36], sizes = [8, 16], strides = [1, 1]} : vector<8x576xf32> to vector<8x16xf32>
    %c0_86 = arith.constant 0 : index
    %c0_87 = arith.constant 0 : index
    %c32 = arith.constant 32 : index
    %71 = vector.load %arg4[%c0_86, %c0_87, %c32] : memref<2x8x256xf32, #tpu.memory_space<vmem>>, vector<1x8x16xf32>
    %72 = vector.shape_cast %71 : vector<1x8x16xf32> to vector<8x16xf32>
    %73 = vector.shape_cast %70 : vector<8x16xf32> to vector<1x8x16xf32>
    tpu.vector_store %arg4[%c0_86, %c0_87, %c32], %73 {strides = array<i32>} : memref<2x8x256xf32, #tpu.memory_space<vmem>>, vector<1x8x16xf32>,
    %74 = vector.extract_strided_slice %61 {offsets = [0, 54], sizes = [8, 16], strides = [1, 1]} : vector<8x576xf32> to vector<8x16xf32>
    %c0_88 = arith.constant 0 : index
    %c0_89 = arith.constant 0 : index
    %c48_90 = arith.constant 48 : index
    %75 = vector.load %arg4[%c0_88, %c0_89, %c48_90] : memref<2x8x256xf32, #tpu.memory_space<vmem>>, vector<1x8x16xf32>
    %76 = vector.shape_cast %75 : vector<1x8x16xf32> to vector<8x16xf32>
    %77 = vector.shape_cast %74 : vector<8x16xf32> to vector<1x8x16xf32>
    tpu.vector_store %arg4[%c0_88, %c0_89, %c48_90], %77 {strides = array<i32>} : memref<2x8x256xf32, #tpu.memory_space<vmem>>, vector<1x8x16xf32>,
    %78 = vector.extract_strided_slice %61 {offsets = [0, 72], sizes = [8, 16], strides = [1, 1]} : vector<8x576xf32> to vector<8x16xf32>
    %c0_91 = arith.constant 0 : index
    %c0_92 = arith.constant 0 : index
    %c64 = arith.constant 64 : index
    %79 = vector.load %arg4[%c0_91, %c0_92, %c64] : memref<2x8x256xf32, #tpu.memory_space<vmem>>, vector<1x8x16xf32>
    %80 = vector.shape_cast %79 : vector<1x8x16xf32> to vector<8x16xf32>
    %81 = vector.shape_cast %78 : vector<8x16xf32> to vector<1x8x16xf32>
    tpu.vector_store %arg4[%c0_91, %c0_92, %c64], %81 {strides = array<i32>} : memref<2x8x256xf32, #tpu.memory_space<vmem>>, vector<1x8x16xf32>,
    %82 = vector.extract_strided_slice %61 {offsets = [0, 90], sizes = [8, 16], strides = [1, 1]} : vector<8x576xf32> to vector<8x16xf32>
    %c0_93 = arith.constant 0 : index
    %c0_94 = arith.constant 0 : index
    %c80 = arith.constant 80 : index
    %83 = vector.load %arg4[%c0_93, %c0_94, %c80] : memref<2x8x256xf32, #tpu.memory_space<vmem>>, vector<1x8x16xf32>
    %84 = vector.shape_cast %83 : vector<1x8x16xf32> to vector<8x16xf32>
    %85 = vector.shape_cast %82 : vector<8x16xf32> to vector<1x8x16xf32>
    tpu.vector_store %arg4[%c0_93, %c0_94, %c80], %85 {strides = array<i32>} : memref<2x8x256xf32, #tpu.memory_space<vmem>>, vector<1x8x16xf32>,
    %86 = vector.extract_strided_slice %61 {offsets = [0, 108], sizes = [8, 16], strides = [1, 1]} : vector<8x576xf32> to vector<8x16xf32>
    %c0_95 = arith.constant 0 : index
    %c0_96 = arith.constant 0 : index
    %c96 = arith.constant 96 : index
    %87 = vector.load %arg4[%c0_95, %c0_96, %c96] : memref<2x8x256xf32, #tpu.memory_space<vmem>>, vector<1x8x16xf32>
    %88 = vector.shape_cast %87 : vector<1x8x16xf32> to vector<8x16xf32>
    %89 = vector.shape_cast %86 : vector<8x16xf32> to vector<1x8x16xf32>
    tpu.vector_store %arg4[%c0_95, %c0_96, %c96], %89 {strides = array<i32>} : memref<2x8x256xf32, #tpu.memory_space<vmem>>, vector<1x8x16xf32>,
    %90 = vector.extract_strided_slice %61 {offsets = [0, 126], sizes = [8, 16], strides = [1, 1]} : vector<8x576xf32> to vector<8x16xf32>
    %c0_97 = arith.constant 0 : index
    %c0_98 = arith.constant 0 : index
    %c112 = arith.constant 112 : index
    %91 = vector.load %arg4[%c0_97, %c0_98, %c112] : memref<2x8x256xf32, #tpu.memory_space<vmem>>, vector<1x8x16xf32>
    %92 = vector.shape_cast %91 : vector<1x8x16xf32> to vector<8x16xf32>
    %93 = vector.shape_cast %90 : vector<8x16xf32> to vector<1x8x16xf32>
    tpu.vector_store %arg4[%c0_97, %c0_98, %c112], %93 {strides = array<i32>} : memref<2x8x256xf32, #tpu.memory_space<vmem>>, vector<1x8x16xf32>,
    %94 = vector.extract_strided_slice %61 {offsets = [0, 144], sizes = [8, 16], strides = [1, 1]} : vector<8x576xf32> to vector<8x16xf32>
    %c0_99 = arith.constant 0 : index
    %c0_100 = arith.constant 0 : index
    %c128 = arith.constant 128 : index
    %95 = vector.load %arg4[%c0_99, %c0_100, %c128] : memref<2x8x256xf32, #tpu.memory_space<vmem>>, vector<1x8x16xf32>
    %96 = vector.shape_cast %95 : vector<1x8x16xf32> to vector<8x16xf32>
    %97 = vector.shape_cast %94 : vector<8x16xf32> to vector<1x8x16xf32>
    tpu.vector_store %arg4[%c0_99, %c0_100, %c128], %97 {strides = array<i32>} : memref<2x8x256xf32, #tpu.memory_space<vmem>>, vector<1x8x16xf32>,
    %98 = vector.extract_strided_slice %61 {offsets = [0, 162], sizes = [8, 16], strides = [1, 1]} : vector<8x576xf32> to vector<8x16xf32>
    %c0_101 = arith.constant 0 : index
    %c0_102 = arith.constant 0 : index
    %c144 = arith.constant 144 : index
    %99 = vector.load %arg4[%c0_101, %c0_102, %c144] : memref<2x8x256xf32, #tpu.memory_space<vmem>>, vector<1x8x16xf32>
    %100 = vector.shape_cast %99 : vector<1x8x16xf32> to vector<8x16xf32>
    %101 = vector.shape_cast %98 : vector<8x16xf32> to vector<1x8x16xf32>
    tpu.vector_store %arg4[%c0_101, %c0_102, %c144], %101 {strides = array<i32>} : memref<2x8x256xf32, #tpu.memory_space<vmem>>, vector<1x8x16xf32>,
    %102 = vector.extract_strided_slice %61 {offsets = [0, 180], sizes = [8, 16], strides = [1, 1]} : vector<8x576xf32> to vector<8x16xf32>
    %c0_103 = arith.constant 0 : index
    %c0_104 = arith.constant 0 : index
    %c160 = arith.constant 160 : index
    %103 = vector.load %arg4[%c0_103, %c0_104, %c160] : memref<2x8x256xf32, #tpu.memory_space<vmem>>, vector<1x8x16xf32>
    %104 = vector.shape_cast %103 : vector<1x8x16xf32> to vector<8x16xf32>
    %105 = vector.shape_cast %102 : vector<8x16xf32> to vector<1x8x16xf32>
    tpu.vector_store %arg4[%c0_103, %c0_104, %c160], %105 {strides = array<i32>} : memref<2x8x256xf32, #tpu.memory_space<vmem>>, vector<1x8x16xf32>,
    %106 = vector.extract_strided_slice %61 {offsets = [0, 198], sizes = [8, 16], strides = [1, 1]} : vector<8x576xf32> to vector<8x16xf32>
    %c0_105 = arith.constant 0 : index
    %c0_106 = arith.constant 0 : index
    %c176 = arith.constant 176 : index
    %107 = vector.load %arg4[%c0_105, %c0_106, %c176] : memref<2x8x256xf32, #tpu.memory_space<vmem>>, vector<1x8x16xf32>
    %108 = vector.shape_cast %107 : vector<1x8x16xf32> to vector<8x16xf32>
    %109 = vector.shape_cast %106 : vector<8x16xf32> to vector<1x8x16xf32>
    tpu.vector_store %arg4[%c0_105, %c0_106, %c176], %109 {strides = array<i32>} : memref<2x8x256xf32, #tpu.memory_space<vmem>>, vector<1x8x16xf32>,
    %110 = vector.extract_strided_slice %61 {offsets = [0, 216], sizes = [8, 16], strides = [1, 1]} : vector<8x576xf32> to vector<8x16xf32>
    %c0_107 = arith.constant 0 : index
    %c0_108 = arith.constant 0 : index
    %c192 = arith.constant 192 : index
    %111 = vector.load %arg4[%c0_107, %c0_108, %c192] : memref<2x8x256xf32, #tpu.memory_space<vmem>>, vector<1x8x16xf32>
    %112 = vector.shape_cast %111 : vector<1x8x16xf32> to vector<8x16xf32>
    %113 = vector.shape_cast %110 : vector<8x16xf32> to vector<1x8x16xf32>
    tpu.vector_store %arg4[%c0_107, %c0_108, %c192], %113 {strides = array<i32>} : memref<2x8x256xf32, #tpu.memory_space<vmem>>, vector<1x8x16xf32>,
    %114 = vector.extract_strided_slice %61 {offsets = [0, 234], sizes = [8, 16], strides = [1, 1]} : vector<8x576xf32> to vector<8x16xf32>
    %c0_109 = arith.constant 0 : index
    %c0_110 = arith.constant 0 : index
    %c208 = arith.constant 208 : index
    %115 = vector.load %arg4[%c0_109, %c0_110, %c208] : memref<2x8x256xf32, #tpu.memory_space<vmem>>, vector<1x8x16xf32>
    %116 = vector.shape_cast %115 : vector<1x8x16xf32> to vector<8x16xf32>
    %117 = vector.shape_cast %114 : vector<8x16xf32> to vector<1x8x16xf32>
    tpu.vector_store %arg4[%c0_109, %c0_110, %c208], %117 {strides = array<i32>} : memref<2x8x256xf32, #tpu.memory_space<vmem>>, vector<1x8x16xf32>,
    %118 = vector.extract_strided_slice %61 {offsets = [0, 252], sizes = [8, 16], strides = [1, 1]} : vector<8x576xf32> to vector<8x16xf32>
    %c0_111 = arith.constant 0 : index
    %c0_112 = arith.constant 0 : index
    %c224 = arith.constant 224 : index
    %119 = vector.load %arg4[%c0_111, %c0_112, %c224] : memref<2x8x256xf32, #tpu.memory_space<vmem>>, vector<1x8x16xf32>
    %120 = vector.shape_cast %119 : vector<1x8x16xf32> to vector<8x16xf32>
    %121 = vector.shape_cast %118 : vector<8x16xf32> to vector<1x8x16xf32>
    tpu.vector_store %arg4[%c0_111, %c0_112, %c224], %121 {strides = array<i32>} : memref<2x8x256xf32, #tpu.memory_space<vmem>>, vector<1x8x16xf32>,
    %122 = vector.extract_strided_slice %61 {offsets = [0, 270], sizes = [8, 16], strides = [1, 1]} : vector<8x576xf32> to vector<8x16xf32>
    %c0_113 = arith.constant 0 : index
    %c0_114 = arith.constant 0 : index
    %c240 = arith.constant 240 : index
    %123 = vector.load %arg4[%c0_113, %c0_114, %c240] : memref<2x8x256xf32, #tpu.memory_space<vmem>>, vector<1x8x16xf32>
    %124 = vector.shape_cast %123 : vector<1x8x16xf32> to vector<8x16xf32>
    %125 = vector.shape_cast %122 : vector<8x16xf32> to vector<1x8x16xf32>
    tpu.vector_store %arg4[%c0_113, %c0_114, %c240], %125 {strides = array<i32>} : memref<2x8x256xf32, #tpu.memory_space<vmem>>, vector<1x8x16xf32>,
    %126 = vector.extract_strided_slice %61 {offsets = [0, 288], sizes = [8, 16], strides = [1, 1]} : vector<8x576xf32> to vector<8x16xf32>
    %c1_115 = arith.constant 1 : index
    %c0_116 = arith.constant 0 : index
    %c0_117 = arith.constant 0 : index
    %127 = vector.load %arg4[%c1_115, %c0_116, %c0_117] : memref<2x8x256xf32, #tpu.memory_space<vmem>>, vector<1x8x16xf32>
    %128 = vector.shape_cast %127 : vector<1x8x16xf32> to vector<8x16xf32>
    %129 = vector.shape_cast %126 : vector<8x16xf32> to vector<1x8x16xf32>
    tpu.vector_store %arg4[%c1_115, %c0_116, %c0_117], %129 {strides = array<i32>} : memref<2x8x256xf32, #tpu.memory_space<vmem>>, vector<1x8x16xf32>,
    %130 = vector.extract_strided_slice %61 {offsets = [0, 306], sizes = [8, 16], strides = [1, 1]} : vector<8x576xf32> to vector<8x16xf32>
    %c1_118 = arith.constant 1 : index
    %c0_119 = arith.constant 0 : index
    %c16_120 = arith.constant 16 : index
    %131 = vector.load %arg4[%c1_118, %c0_119, %c16_120] : memref<2x8x256xf32, #tpu.memory_space<vmem>>, vector<1x8x16xf32>
    %132 = vector.shape_cast %131 : vector<1x8x16xf32> to vector<8x16xf32>
    %133 = vector.shape_cast %130 : vector<8x16xf32> to vector<1x8x16xf32>
    tpu.vector_store %arg4[%c1_118, %c0_119, %c16_120], %133 {strides = array<i32>} : memref<2x8x256xf32, #tpu.memory_space<vmem>>, vector<1x8x16xf32>,
    %134 = vector.extract_strided_slice %61 {offsets = [0, 324], sizes = [8, 16], strides = [1, 1]} : vector<8x576xf32> to vector<8x16xf32>
    %c1_121 = arith.constant 1 : index
    %c0_122 = arith.constant 0 : index
    %c32_123 = arith.constant 32 : index
    %135 = vector.load %arg4[%c1_121, %c0_122, %c32_123] : memref<2x8x256xf32, #tpu.memory_space<vmem>>, vector<1x8x16xf32>
    %136 = vector.shape_cast %135 : vector<1x8x16xf32> to vector<8x16xf32>
    %137 = vector.shape_cast %134 : vector<8x16xf32> to vector<1x8x16xf32>
    tpu.vector_store %arg4[%c1_121, %c0_122, %c32_123], %137 {strides = array<i32>} : memref<2x8x256xf32, #tpu.memory_space<vmem>>, vector<1x8x16xf32>,
    %138 = vector.extract_strided_slice %61 {offsets = [0, 342], sizes = [8, 16], strides = [1, 1]} : vector<8x576xf32> to vector<8x16xf32>
    %c1_124 = arith.constant 1 : index
    %c0_125 = arith.constant 0 : index
    %c48_126 = arith.constant 48 : index
    %139 = vector.load %arg4[%c1_124, %c0_125, %c48_126] : memref<2x8x256xf32, #tpu.memory_space<vmem>>, vector<1x8x16xf32>
    %140 = vector.shape_cast %139 : vector<1x8x16xf32> to vector<8x16xf32>
    %141 = vector.shape_cast %138 : vector<8x16xf32> to vector<1x8x16xf32>
    tpu.vector_store %arg4[%c1_124, %c0_125, %c48_126], %141 {strides = array<i32>} : memref<2x8x256xf32, #tpu.memory_space<vmem>>, vector<1x8x16xf32>,
    %142 = vector.extract_strided_slice %61 {offsets = [0, 360], sizes = [8, 16], strides = [1, 1]} : vector<8x576xf32> to vector<8x16xf32>
    %c1_127 = arith.constant 1 : index
    %c0_128 = arith.constant 0 : index
    %c64_129 = arith.constant 64 : index
    %143 = vector.load %arg4[%c1_127, %c0_128, %c64_129] : memref<2x8x256xf32, #tpu.memory_space<vmem>>, vector<1x8x16xf32>
    %144 = vector.shape_cast %143 : vector<1x8x16xf32> to vector<8x16xf32>
    %145 = vector.shape_cast %142 : vector<8x16xf32> to vector<1x8x16xf32>
    tpu.vector_store %arg4[%c1_127, %c0_128, %c64_129], %145 {strides = array<i32>} : memref<2x8x256xf32, #tpu.memory_space<vmem>>, vector<1x8x16xf32>,
    %146 = vector.extract_strided_slice %61 {offsets = [0, 378], sizes = [8, 16], strides = [1, 1]} : vector<8x576xf32> to vector<8x16xf32>
    %c1_130 = arith.constant 1 : index
    %c0_131 = arith.constant 0 : index
    %c80_132 = arith.constant 80 : index
    %147 = vector.load %arg4[%c1_130, %c0_131, %c80_132] : memref<2x8x256xf32, #tpu.memory_space<vmem>>, vector<1x8x16xf32>
    %148 = vector.shape_cast %147 : vector<1x8x16xf32> to vector<8x16xf32>
    %149 = vector.shape_cast %146 : vector<8x16xf32> to vector<1x8x16xf32>
    tpu.vector_store %arg4[%c1_130, %c0_131, %c80_132], %149 {strides = array<i32>} : memref<2x8x256xf32, #tpu.memory_space<vmem>>, vector<1x8x16xf32>,
    %150 = vector.extract_strided_slice %61 {offsets = [0, 396], sizes = [8, 16], strides = [1, 1]} : vector<8x576xf32> to vector<8x16xf32>
    %c1_133 = arith.constant 1 : index
    %c0_134 = arith.constant 0 : index
    %c96_135 = arith.constant 96 : index
    %151 = vector.load %arg4[%c1_133, %c0_134, %c96_135] : memref<2x8x256xf32, #tpu.memory_space<vmem>>, vector<1x8x16xf32>
    %152 = vector.shape_cast %151 : vector<1x8x16xf32> to vector<8x16xf32>
    %153 = vector.shape_cast %150 : vector<8x16xf32> to vector<1x8x16xf32>
    tpu.vector_store %arg4[%c1_133, %c0_134, %c96_135], %153 {strides = array<i32>} : memref<2x8x256xf32, #tpu.memory_space<vmem>>, vector<1x8x16xf32>,
    %154 = vector.extract_strided_slice %61 {offsets = [0, 414], sizes = [8, 16], strides = [1, 1]} : vector<8x576xf32> to vector<8x16xf32>
    %c1_136 = arith.constant 1 : index
    %c0_137 = arith.constant 0 : index
    %c112_138 = arith.constant 112 : index
    %155 = vector.load %arg4[%c1_136, %c0_137, %c112_138] : memref<2x8x256xf32, #tpu.memory_space<vmem>>, vector<1x8x16xf32>
    %156 = vector.shape_cast %155 : vector<1x8x16xf32> to vector<8x16xf32>
    %157 = vector.shape_cast %154 : vector<8x16xf32> to vector<1x8x16xf32>
    tpu.vector_store %arg4[%c1_136, %c0_137, %c112_138], %157 {strides = array<i32>} : memref<2x8x256xf32, #tpu.memory_space<vmem>>, vector<1x8x16xf32>,
    %158 = vector.extract_strided_slice %61 {offsets = [0, 432], sizes = [8, 16], strides = [1, 1]} : vector<8x576xf32> to vector<8x16xf32>
    %c1_139 = arith.constant 1 : index
    %c0_140 = arith.constant 0 : index
    %c128_141 = arith.constant 128 : index
    %159 = vector.load %arg4[%c1_139, %c0_140, %c128_141] : memref<2x8x256xf32, #tpu.memory_space<vmem>>, vector<1x8x16xf32>
    %160 = vector.shape_cast %159 : vector<1x8x16xf32> to vector<8x16xf32>
    %161 = vector.shape_cast %158 : vector<8x16xf32> to vector<1x8x16xf32>
    tpu.vector_store %arg4[%c1_139, %c0_140, %c128_141], %161 {strides = array<i32>} : memref<2x8x256xf32, #tpu.memory_space<vmem>>, vector<1x8x16xf32>,
    %162 = vector.extract_strided_slice %61 {offsets = [0, 450], sizes = [8, 16], strides = [1, 1]} : vector<8x576xf32> to vector<8x16xf32>
    %c1_142 = arith.constant 1 : index
    %c0_143 = arith.constant 0 : index
    %c144_144 = arith.constant 144 : index
    %163 = vector.load %arg4[%c1_142, %c0_143, %c144_144] : memref<2x8x256xf32, #tpu.memory_space<vmem>>, vector<1x8x16xf32>
    %164 = vector.shape_cast %163 : vector<1x8x16xf32> to vector<8x16xf32>
    %165 = vector.shape_cast %162 : vector<8x16xf32> to vector<1x8x16xf32>
    tpu.vector_store %arg4[%c1_142, %c0_143, %c144_144], %165 {strides = array<i32>} : memref<2x8x256xf32, #tpu.memory_space<vmem>>, vector<1x8x16xf32>,
    %166 = vector.extract_strided_slice %61 {offsets = [0, 468], sizes = [8, 16], strides = [1, 1]} : vector<8x576xf32> to vector<8x16xf32>
    %c1_145 = arith.constant 1 : index
    %c0_146 = arith.constant 0 : index
    %c160_147 = arith.constant 160 : index
    %167 = vector.load %arg4[%c1_145, %c0_146, %c160_147] : memref<2x8x256xf32, #tpu.memory_space<vmem>>, vector<1x8x16xf32>
    %168 = vector.shape_cast %167 : vector<1x8x16xf32> to vector<8x16xf32>
    %169 = vector.shape_cast %166 : vector<8x16xf32> to vector<1x8x16xf32>
    tpu.vector_store %arg4[%c1_145, %c0_146, %c160_147], %169 {strides = array<i32>} : memref<2x8x256xf32, #tpu.memory_space<vmem>>, vector<1x8x16xf32>,
    %170 = vector.extract_strided_slice %61 {offsets = [0, 486], sizes = [8, 16], strides = [1, 1]} : vector<8x576xf32> to vector<8x16xf32>
    %c1_148 = arith.constant 1 : index
    %c0_149 = arith.constant 0 : index
    %c176_150 = arith.constant 176 : index
    %171 = vector.load %arg4[%c1_148, %c0_149, %c176_150] : memref<2x8x256xf32, #tpu.memory_space<vmem>>, vector<1x8x16xf32>
    %172 = vector.shape_cast %171 : vector<1x8x16xf32> to vector<8x16xf32>
    %173 = vector.shape_cast %170 : vector<8x16xf32> to vector<1x8x16xf32>
    tpu.vector_store %arg4[%c1_148, %c0_149, %c176_150], %173 {strides = array<i32>} : memref<2x8x256xf32, #tpu.memory_space<vmem>>, vector<1x8x16xf32>,
    %174 = vector.extract_strided_slice %61 {offsets = [0, 504], sizes = [8, 16], strides = [1, 1]} : vector<8x576xf32> to vector<8x16xf32>
    %c1_151 = arith.constant 1 : index
    %c0_152 = arith.constant 0 : index
    %c192_153 = arith.constant 192 : index
    %175 = vector.load %arg4[%c1_151, %c0_152, %c192_153] : memref<2x8x256xf32, #tpu.memory_space<vmem>>, vector<1x8x16xf32>
    %176 = vector.shape_cast %175 : vector<1x8x16xf32> to vector<8x16xf32>
    %177 = vector.shape_cast %174 : vector<8x16xf32> to vector<1x8x16xf32>
    tpu.vector_store %arg4[%c1_151, %c0_152, %c192_153], %177 {strides = array<i32>} : memref<2x8x256xf32, #tpu.memory_space<vmem>>, vector<1x8x16xf32>,
    %178 = vector.extract_strided_slice %61 {offsets = [0, 522], sizes = [8, 16], strides = [1, 1]} : vector<8x576xf32> to vector<8x16xf32>
    %c1_154 = arith.constant 1 : index
    %c0_155 = arith.constant 0 : index
    %c208_156 = arith.constant 208 : index
    %179 = vector.load %arg4[%c1_154, %c0_155, %c208_156] : memref<2x8x256xf32, #tpu.memory_space<vmem>>, vector<1x8x16xf32>
    %180 = vector.shape_cast %179 : vector<1x8x16xf32> to vector<8x16xf32>
    %181 = vector.shape_cast %178 : vector<8x16xf32> to vector<1x8x16xf32>
    tpu.vector_store %arg4[%c1_154, %c0_155, %c208_156], %181 {strides = array<i32>} : memref<2x8x256xf32, #tpu.memory_space<vmem>>, vector<1x8x16xf32>,
    %182 = vector.extract_strided_slice %61 {offsets = [0, 540], sizes = [8, 16], strides = [1, 1]} : vector<8x576xf32> to vector<8x16xf32>
    %c1_157 = arith.constant 1 : index
    %c0_158 = arith.constant 0 : index
    %c224_159 = arith.constant 224 : index
    %183 = vector.load %arg4[%c1_157, %c0_158, %c224_159] : memref<2x8x256xf32, #tpu.memory_space<vmem>>, vector<1x8x16xf32>
    %184 = vector.shape_cast %183 : vector<1x8x16xf32> to vector<8x16xf32>
    %185 = vector.shape_cast %182 : vector<8x16xf32> to vector<1x8x16xf32>
    tpu.vector_store %arg4[%c1_157, %c0_158, %c224_159], %185 {strides = array<i32>} : memref<2x8x256xf32, #tpu.memory_space<vmem>>, vector<1x8x16xf32>,
    %186 = vector.extract_strided_slice %61 {offsets = [0, 558], sizes = [8, 16], strides = [1, 1]} : vector<8x576xf32> to vector<8x16xf32>
    %c1_160 = arith.constant 1 : index
    %c0_161 = arith.constant 0 : index
    %c240_162 = arith.constant 240 : index
    %187 = vector.load %arg4[%c1_160, %c0_161, %c240_162] : memref<2x8x256xf32, #tpu.memory_space<vmem>>, vector<1x8x16xf32>
    %188 = vector.shape_cast %187 : vector<1x8x16xf32> to vector<8x16xf32>
    %189 = vector.shape_cast %186 : vector<8x16xf32> to vector<1x8x16xf32>
    tpu.vector_store %arg4[%c1_160, %c0_161, %c240_162], %189 {strides = array<i32>} : memref<2x8x256xf32, #tpu.memory_space<vmem>>, vector<1x8x16xf32>,
    return
  }
  func.func @transform_0(%arg0: i32) -> (i32, i32, i32) {
    %c0_i32 = arith.constant 0 : i32
    %c0_i32_0 = arith.constant 0 : i32
    %c0_i32_1 = arith.constant 0 : i32
    return %arg0, %c0_i32, %c0_i32_0 : i32, i32, i32
  }
  func.func @transform_1(%arg0: i32) -> (i32, i32) {
    %c0_i32 = arith.constant 0 : i32
    %c0_i32_0 = arith.constant 0 : i32
    %c0_i32_1 = arith.constant 0 : i32
    return %c0_i32, %c0_i32_0 : i32, i32
  }
  func.func @transform_2(%arg0: i32) -> (i32, i32) {
    %c0_i32 = arith.constant 0 : i32
    %c0_i32_0 = arith.constant 0 : i32
    %c0_i32_1 = arith.constant 0 : i32
    return %c0_i32, %c0_i32_0 : i32, i32
  }
  func.func @transform_3(%arg0: i32) -> (i32, i32, i32) {
    %c0_i32 = arith.constant 0 : i32
    %c0_i32_0 = arith.constant 0 : i32
    %c0_i32_1 = arith.constant 0 : i32
    return %arg0, %c0_i32, %c0_i32_0 : i32, i32, i32
  }
}

</mosaic_0001>

<bundles_post_ra>
// kernel: _lambda_.1
= control target key start
LH: loop header
LB: loop body
LE: loop exit
PB: predicated region body
PF: predicated region fallthrough
CT: control target
= control target key end

     0   :  { %s1035_s16 = smov 127   ;;  %s1036_s21 = smov 126   ;;  %vm18_vm0 = vcmask 256000   ;;  %v1049_v57 = vmov 0   ;;  %vm51_vm1 = vcmask 257027   ;;  %vm40_vm2 = vcmask 1043456   ;;  %s1592_s0 = inlined_call_operand.vmem [shape: bf16[2,6,342], index: 0, kind: input, shape index: {}]   ;;  %s1593_s2 = inlined_call_operand.vmem [shape: f32[8,1], index: 2, kind: input, shape index: {}]   ;;  %s1594_s1 = inlined_call_operand.vmem [shape: bf16[8,54], index: 1, kind: input, shape index: {}]   ;;  %s1595_s3 = inlined_call_operand.vmem [shape: f32[2,8,256], index: 3, kind: output, shape index: {}]  }
   0x1   :  { %v20_v0 = vld [vmem:[%s1592_s0] sm:$0x77]  ;;  %v21_v1 = vld [vmem:[%s1592_s0 + $0x8] sm:$0x7]  ;;  %s1037_s26 = smov 110   ;;  %s1038_s10 = smov 109   ;;  %638 = vmatprep.mubr.bf16.mxu0 %v1049_v57  ;;  %679 = vmatprep.mubr.bf16.mxu1 %v1049_v57 }
   0x2   :  { %v24_v2 = vrot.slane %v20_v0, 5  ;;  %v25_v3 = vrot.slane %v21_v1, 5  ;;  %v56_v5 = vld [vmem:[%s1592_s0] sm:$0x77]  ;;  %v57_v7 = vld [vmem:[%s1592_s0 + $0x8] sm:$0x7]  ;;  %1012 = vset.pattern.permute.xlu0 %v1049_v57 }
   0x3   :  { %v60_v8 = vrot.slane %v56_v5, 6  ;;  %v61_v9 = vrot.slane %v57_v7, 6  ;;  %v91_v11 = vld [vmem:[%s1592_s0] sm:$0x77]  ;;  %v92_v13 = vld [vmem:[%s1592_s0 + $0x8] sm:$0x7] }
   0x4   :  { %28 = vrot.lane.b32.xlu0 %v24_v2, %s1035_s16  ;;  %v26_v4 = vrot.slane %v24_v2, 4  ;;  %v27_v6 = vrot.slane %v25_v3, 4  ;;  %v95_v14 = vrot.slane %v91_v11, 7  ;;  %v96_v15 = vrot.slane %v92_v13, 7  ;;  %v111_v16 = vld [vmem:[%s1592_s0] sm:$0x77] }
   0x5   :  { %v62_v10 = vrot.slane %v60_v8, 4  ;;  %v63_v12 = vrot.slane %v61_v9, 4  ;;  %v128_v17 = vld [vmem:[%s1592_s0] sm:$0x77]  ;;  %v112_v19 = vld [vmem:[%s1592_s0 + $0x8] sm:$0x7] }
   0x6   :  { %32 = vrot.lane.b32.xlu1 %v26_v4, %s1035_s16  ;;  %v15_v18 = vld [vmem:[%s1592_s0] sm:$0x77]  ;;  %v129_v20 = vld [vmem:[%s1592_s0 + $0x8] sm:$0x7]  ;;  %v132_v21 = vrot.slane %v128_v17, 5  ;;  %s1039_s11 = smov 108  }
   0x7   :  { %17 = vst [vmem:[#allocation2] sm:$0x77] %v15_v18  ;;  %v133_v22 = vrot.slane %v129_v20, 5  ;;  %v161_v24 = vld [vmem:[%s1592_s0] sm:$0x77]  ;;  %s1041_s24 = smov 91  }
   0x8   :  { %30 = vrot.lane.b32.xlu0 %v25_v3, %s1035_s16  ;;  %v134_v23 = vrot.slane %v132_v21, 4  ;;  %v162_v26 = vld [vmem:[%s1592_s0 + $0x8] sm:$0x7]  ;;  %v165_v27 = vrot.slane %v161_v24, 6  ;;  %v194_v30 = vld [vmem:[%s1592_s0] sm:$0x77] }
   0x9   :  { %v135_v25 = vrot.slane %v133_v22, 4  ;;  %v166_v28 = vrot.slane %v162_v26, 6  ;;  %v195_v32 = vld [vmem:[%s1592_s0 + $0x8] sm:$0x7]  ;;  %v198_v33 = vrot.slane %v194_v30, 7  ;;  %s1042_s5 = smov 90  }
   0xa   :  { %34 = vrot.lane.b32.xlu1 %v27_v6, %s1035_s16  ;;  %s1040_s16 = smov 92   ;;  %v167_v29 = vrot.slane %v165_v27, 4  ;;  %v16_v34 = vld [vmem:[%s1592_s0 + $0x8] sm:$0x7]  ;;  %v199_v35 = vrot.slane %v195_v32, 7  ;;  %s1044_s12 = smov 31  }
   0xb   :  { %v168_v31 = vrot.slane %v166_v28, 4  ;;  %19 = vst.msk [vmem:[#allocation2 + $0x8] sm:$0x7] %vm18_vm0, %v16_v34  ;;  %v213_v36 = vld [vmem:[%s1592_s0] sm:$0x77]  ;;  %s1045_s15 = smov 30  }
   0xc   :  { %64 = vrot.lane.b32.xlu0 %v60_v8, %s1036_s21  ;;  %v894_v37 = vld [vmem:[%s1592_s0 + $0xc] sm:$0x77]  ;;  %v214_v38 = vld [vmem:[%s1592_s0 + $0x8] sm:$0x7]  ;;  %v895_v49 = vld [vmem:[%s1592_s0 + $0x14] sm:$0x7] }
   0xd   :  { %v255_v39 = vrot.slane %v894_v37, 5  ;;  %v892_v40 = vld [vmem:[%s1592_s0 + $0xc] sm:$0x77]  ;;  %s1047_s25 = smov 13   ;;  %v256_v51 = vrot.slane %v895_v49, 5  ;;  %s1048_s29 = smov 12  }
   0xe   :  { %66 = vrot.lane.b32.xlu1 %v61_v9, %s1036_s21  ;;  %v896_v41 = vld [vmem:[%s1592_s0 + $0xc] sm:$0x77]  ;;  %v893_v52 = vld [vmem:[%s1592_s0 + $0x14] sm:$0x7]  ;;  %v489_v13 = vld [vmem:[%s1593_s2] sm:$0xff]  ;;  %vm54_vm3 = vcmask 254976  }
   0xf   :  { %v257_v42 = vrot.slane %v255_v39, 4  ;;  %v294_v43 = vrot.slane %v896_v41, 6  ;;  %v898_v44 = vld [vmem:[%s1592_s0 + $0xc] sm:$0x77]  ;;  %v897_v53 = vld [vmem:[%s1592_s0 + $0x14] sm:$0x7] }
  0x10   :  { %68 = vrot.lane.b32.xlu0 %v62_v10, %s1036_s21  ;;  %v333_v46 = vrot.slane %v898_v44, 7  ;;  %v902_v47 = vld [vmem:[%s1592_s0 + $0xc] sm:$0x77]  ;;  %v258_v54 = vrot.slane %v256_v51, 4  ;;  %v295_v56 = vrot.slane %v897_v53, 6  ;;  %vm42_vm4 = vcmask 1039360  }
  0x11   :  { %v296_v45 = vrot.slane %v294_v43, 4  ;;  %v900_v48 = vld [vmem:[%s1592_s0 + $0xc] sm:$0x77]  ;;  %v371_v50 = vrot.slane %v902_v47, 5  ;;  %v905_v58 = vld [vmem:[%s1592_s0 + $0x14] sm:$0x7] }
  0x12   :  { %70 = vrot.lane.b32.xlu1 %v63_v12, %s1036_s21  ;;  %v904_v55 = vld [vmem:[%s1592_s0 + $0xc] sm:$0x77]  ;;  %v403_v60 = vrot.slane %v905_v58, 6  ;;  %v907_v0 = vld [vmem:[%s1592_s0 + $0x14] sm:$0x7]  ;;  %v297_v5 = vrot.slane %v295_v56, 4 }
  0x13   :  { %v402_v59 = vrot.slane %v904_v55, 6  ;;  %v906_v62 = vld [vmem:[%s1592_s0 + $0xc] sm:$0x77]  ;;  %v436_v2 = vrot.slane %v907_v0, 7  ;;  %v373_v3 = vrot.slane %v371_v50, 4  ;;  %vm86_vm5 = vcmask 257026  }
  0x14   :  { %97 = vrot.lane.b32.xlu0 %v95_v14, %s1037_s26  ;;  %v405_v63 = vrot.slane %v403_v60, 4  ;;  %v435_v1 = vrot.slane %v906_v62, 7  ;;  %v899_v4 = vld [vmem:[%s1592_s0 + $0x14] sm:$0x7]  ;;  %v908_v10 = vld [vmem:[%s1592_s0 + $0xc] sm:$0x77] }
  0x15   :  { %v404_v61 = vrot.slane %v402_v59, 4  ;;  %v334_v6 = vrot.slane %v899_v4, 7  ;;  %v903_v7 = vld [vmem:[%s1592_s0 + $0x14] sm:$0x7]  ;;  %vm77_vm6 = vcmask 1031168   ;;  %vm89_vm7 = vcmask 253952  }
  0x16   :  { %99 = vrot.lane.b32.xlu1 %v96_v15, %s1037_s26  ;;  %v901_v8 = vld [vmem:[%s1592_s0 + $0x14] sm:$0x7]  ;;  %v372_v9 = vrot.slane %v903_v7, 5  ;;  %vm109_vm8 = vcmask 257025   ;;  %vm104_vm9 = vcmask 900096   ;;  %vm122_vm10 = vcmask 891904  }
  0x17   :  { %v909_v11 = vld [vmem:[%s1592_s0 + $0x14] sm:$0x7]  ;;  %vm149_vm11 = vcmask 883712   ;;  %vm182_vm12 = vcmask 752640   ;;  %vm207_vm13 = vcmask 744448   ;;  %vm245_vm14 = vcmask 1042688  }
  0x18   :  { %115 = vrot.lane.b32.xlu0 %v111_v16, %s1038_s10  ;;  %v374_v12 = vrot.slane %v372_v9, 4  ;;  %vm246_vm15 = vcmask 1046532   ;;  %s1055_s8 = smov 94   ;;  %s1056_s9 = smov 96  }
  0x19   :  { %s1057_s13 = smov 88   ;;  %s1058_s14 = smov 86  }
  0x1a   :  { %117 = vrot.lane.b32.xlu1 %v112_v19, %s1038_s10  ;;  %s1043_s10 = smov 32   ;;  %s1059_s17 = smov 100  }
  0x1b   :  { %s1060_s18 = smov 98   ;;  %s1064_s19 = smov 118  }
  0x1c   :  { %136 = vrot.lane.b32.xlu0 %v132_v21, %s1039_s11  ;;  %s1065_s20 = smov 76   ;;  %s1066_s22 = smov 114  }
  0x1d   :  { %s1067_s23 = smov 72   ;;  %s1069_s27 = smov 120  }
  0x1e   :  { %138 = vrot.lane.b32.xlu1 %v133_v22, %s1039_s11  ;;  %s1071_s28 = smov 116   ;;  %s1072_s30 = smov 104  }
  0x1f   :  { %s1073_s4 = smov 112   ;;  %s1074_s6 = smov 102  }
  0x20   :  { %140 = vrot.lane.b32.xlu0 %v134_v23, %s1039_s11  ;;  %s1076_s7 = smov 66  }
  0x22   :  { %142 = vrot.lane.b32.xlu1 %v135_v25, %s1039_s11 }
  0x24   :  { %169 = vrot.lane.b32.xlu0 %v165_v27, %s1040_s16 }
  0x26   :  { %171 = vrot.lane.b32.xlu1 %v166_v28, %s1040_s16 }
  0x28   :  { %173 = vrot.lane.b32.xlu0 %v167_v29, %s1040_s16 }
  0x2a   :  { %175 = vrot.lane.b32.xlu1 %v168_v31, %s1040_s16 }
  0x2c   :  { %200 = vrot.lane.b32.xlu0 %v198_v33, %s1041_s24 }
  0x2e   :  { %202 = vrot.lane.b32.xlu1 %v199_v35, %s1041_s24  ;;  %s1046_s24 = smov 14  }
  0x30   :  { %217 = vrot.lane.b32.xlu0 %v213_v36, %s1042_s5 }
  0x32   :  { %219 = vrot.lane.b32.xlu1 %v214_v38, %s1042_s5 }
  0x34   :  { %235 = vrot.lane.b32.xlu0 %v892_v40, %s1043_s10 }
  0x36   :  { %259 = vrot.lane.b32.xlu1 %v255_v39, %s1044_s12 }
  0x38   :  { %263 = vrot.lane.b32.xlu0 %v257_v42, %s1044_s12 }
  0x3a   :  { %298 = vrot.lane.b32.xlu1 %v294_v43, %s1045_s15 }
  0x3c   :  { %302 = vrot.lane.b32.xlu0 %v296_v45, %s1045_s15 }
  0x3e   :  { %335 = vrot.lane.b32.xlu1 %v333_v46, %s1046_s24 }
  0x40   :  { %355 = vrot.lane.b32.xlu0 %v900_v48, %s1047_s25 }
  0x42   :  { %375 = vrot.lane.b32.xlu1 %v371_v50, %s1048_s29 }
  0x44   :  { %237 = vrot.lane.b32.xlu0 %v893_v52, %s1043_s10  ;;  %s1050_s10 = smov 124  }
  0x46   :  { %261 = vrot.lane.b32.xlu1 %v256_v51, %s1044_s12 }
  0x48   :  { %265 = vrot.lane.b32.xlu0 %v258_v54, %s1044_s12  ;;  %s1051_s12 = smov 123  }
  0x4a   :  { %300 = vrot.lane.b32.xlu1 %v295_v56, %s1045_s15 }
  0x4c   :  { %406 = vrot.lane.b32.xlu0 %v402_v59, %s1050_s10 }
  0x4e   :  { %408 = vrot.lane.b32.xlu1 %v403_v60, %s1050_s10 }
  0x50   :  { %410 = vrot.lane.b32.xlu0 %v404_v61, %s1050_s10 }
  0x52   :  { %412 = vrot.lane.b32.xlu1 %v405_v63, %s1050_s10 }
  0x54   :  { %437 = vrot.lane.b32.xlu0 %v435_v1, %s1051_s12 }
  0x56   :  { %439 = vrot.lane.b32.xlu1 %v436_v2, %s1051_s12  ;;  %s1063_s12 = smov 80  }
  0x58   :  { %379 = vrot.lane.b32.xlu0 %v373_v3, %s1048_s29 }
  0x5a   :  { %304 = vrot.lane.b32.xlu1 %v297_v5, %s1045_s15  ;;  %s1052_s15 = smov 122  }
  0x5c   :  { %337 = vrot.lane.b32.xlu0 %v334_v6, %s1046_s24  ;;  %s1078_s24 = smov 82  }
  0x5e   :  { %357 = vrot.lane.b32.xlu1 %v901_v8, %s1047_s25 }
  0x60   :  { %377 = vrot.lane.b32.xlu0 %v372_v9, %s1048_s29 }
  0x62   :  { %454 = vrot.lane.b32.xlu1 %v908_v10, %s1052_s15 }
  0x64   :  { %456 = vrot.lane.b32.xlu0 %v909_v11, %s1052_s15 }
  0x66   :  { %381 = vrot.lane.b32.xlu1 %v374_v12, %s1048_s29 }
  0x68   :  { %492 = vperm.xlu0 %1012, %v489_v13  }
  0x76   :  { %v29_v14 = vpop.permute.xlu0 %28 }
  0x77   :  { %v36_v17 = vrot.slane %v29_v14, 4 }
  0x78   :  { %v33_v15 = vpop.permute.xlu1 %32 }
  0x79   :  { %v38_v20 = vrot.slane %v33_v15, 4 }
  0x7a   :  { %v31_v16 = vpop.permute.xlu0 %30 }
  0x7b   :  { %v37_v18 = vrot.slane %v31_v16, 4  ;;  %52 = vst.msk [vmem:[#allocation2 + $0x8] sm:$0x8] %vm51_vm1, %v31_v16 }
  0x7c   :  { %v35_v19 = vpop.permute.xlu1 %34 }
  0x7d   :  { %v41_v21 = vsel %vm40_vm2, %v36_v17, %v37_v18  ;;  %v39_v22 = vrot.slane %v35_v19, 4  ;;  %55 = vst.msk [vmem:[#allocation2 + $0x1c] sm:$0x3] %vm54_vm3, %v35_v19 }
  0x7e   :  { %v43_v23 = vsel %vm42_vm4, %v29_v14, %v41_v21  ;;  %v65_v24 = vpop.permute.xlu0 %64 }
  0x7f   :  { %50 = vst [vmem:[#allocation2] sm:$0x88] %v43_v23  ;;  %v44_v25 = vsel %vm40_vm2, %v38_v20, %v39_v22  ;;  %v72_v28 = vrot.slane %v65_v24, 4 }
  0x80   :  { %v45_v26 = vsel %vm42_vm4, %v33_v15, %v44_v25  ;;  %v67_v27 = vpop.permute.xlu1 %66  ;;  %vm278_vm4 = vcmask 1043715  }
  0x81   :  { %53 = vst [vmem:[#allocation2 + $0x14] sm:$0x33] %v45_v26  ;;  %v73_v29 = vrot.slane %v67_v27, 4  ;;  %87 = vst.msk [vmem:[#allocation2 + $0x1c] sm:$0xc] %vm86_vm5, %v67_v27 }
  0x82   :  { %v69_v30 = vpop.permute.xlu0 %68 }
  0x83   :  { %v76_v31 = vsel %vm40_vm2, %v72_v28, %v73_v29  ;;  %v74_v34 = vrot.slane %v69_v30, 4 }
  0x84   :  { %v78_v32 = vsel %vm77_vm6, %v65_v24, %v76_v31  ;;  %v71_v33 = vpop.permute.xlu1 %70 }
  0x85   :  { %85 = vst [vmem:[#allocation2 + $0x14] sm:$0xcc] %v78_v32  ;;  %v75_v35 = vrot.slane %v71_v33, 4  ;;  %90 = vst.msk [vmem:[#allocation2 + $0x30] sm:$0x1] %vm89_vm7, %v71_v33 }
  0x86   :  { %v98_v36 = vpop.permute.xlu0 %97  ;;  %v468_v46 = vld [vmem:[#allocation2] sm:$0xff] }
  0x87   :  { %v79_v37 = vsel %vm40_vm2, %v74_v34, %v75_v35  ;;  %v101_v40 = vrot.slane %v98_v36, 4 }
  0x88   :  { %v80_v38 = vsel %vm77_vm6, %v69_v30, %v79_v37  ;;  %v100_v39 = vpop.permute.xlu1 %99  ;;  %vm1277_vm6 = vmor %vm246_vm15, %vm245_vm14  ;;  %vm323_vm14 = vcmask 1040640   ;;  %vm324_vm15 = vcmask 1044484  }
  0x89   :  { %88 = vst [vmem:[#allocation2 + $0x28] sm:$0x11] %v80_v38  ;;  %v102_v41 = vrot.slane %v100_v39, 4  ;;  %110 = vst.msk [vmem:[#allocation2 + $0x30] sm:$0xe] %vm109_vm8, %v100_v39 }
  0x8a   :  { %v116_v42 = vpop.permute.xlu0 %115 }
  0x8b   :  { %v103_v43 = vsel %vm40_vm2, %v101_v40, %v102_v41  ;;  %v119_v49 = vrot.slane %v116_v42, 4 }
  0x8c   :  { %v105_v44 = vsel %vm104_vm9, %v98_v36, %v103_v43  ;;  %v118_v45 = vpop.permute.xlu1 %117  ;;  %v471_v47 = vld [vmem:[#allocation2 + $0x14] sm:$0xff]  ;;  %vm285_vm9 = vcmask 1045508  }
  0x8d   :  { %v1013_v48 = vld [vmem:[#allocation2 + $0x4] ss:$20 sps:$4 sm:$0xff]   ;;  %108 = vst [vmem:[#allocation2 + $0x28] sm:$0xee] %v105_v44  ;;  %v120_v50 = vrot.slane %v118_v45, 4  ;;  %v910_v51 = vcombine.low %v468_v46, %v471_v47 }
  0x8e   :  { %127 = vst.msk [vmem:[#allocation2 + $0x44] sm:$0x7] %vm18_vm0, %v118_v45  ;;  %v137_v52 = vpop.permute.xlu0 %136  ;;  %606 = vmatprep.subr.bf16.mxu0 %v1013_v48 }
  0x8f   :  { %v121_v53 = vsel %vm40_vm2, %v119_v49, %v120_v50  ;;  %607 = vmatpush1.bf16.msra.mxu0 %v910_v51  ;;  %v144_v56 = vrot.slane %v137_v52, 4 }
  0x90   :  { %v123_v54 = vsel %vm122_vm10, %v116_v42, %v121_v53  ;;  %v139_v55 = vpop.permute.xlu1 %138  ;;  %vm317_vm10 = vcmask 1043714  }
  0x91   :  { %126 = vst [vmem:[#allocation2 + $0x3c] sm:$0x77] %v123_v54  ;;  %v145_v57 = vrot.slane %v139_v55, 4  ;;  %158 = vst.msk [vmem:[#allocation2 + $0x44] sm:$0x8] %vm51_vm1, %v139_v55  ;;  %vm224_vm1 = vcmask 736256  }
  0x92   :  { %v141_v58 = vpop.permute.xlu0 %140 }
  0x93   :  { %v148_v59 = vsel %vm40_vm2, %v144_v56, %v145_v57  ;;  %v146_v62 = vrot.slane %v141_v58, 4 }
  0x94   :  { %v150_v60 = vsel %vm149_vm11, %v137_v52, %v148_v59  ;;  %v143_v61 = vpop.permute.xlu1 %142  ;;  %v474_v10 = vld [vmem:[#allocation2 + $0x28] sm:$0xff] }
  0x95   :  { %157 = vst [vmem:[#allocation2 + $0x3c] sm:$0x88] %v150_v60  ;;  %v147_v63 = vrot.slane %v143_v61, 4  ;;  %160 = vst.msk [vmem:[#allocation2 + $0x58] sm:$0x3] %vm54_vm3, %v143_v61  ;;  %vm240_vm3 = vcmask 261120  }
  0x96   :  { %v170_v0 = vpop.permute.xlu0 %169 }
  0x97   :  { %v151_v1 = vsel %vm40_vm2, %v146_v62, %v147_v63  ;;  %v177_v4 = vrot.slane %v170_v0, 4 }
  0x98   :  { %v152_v2 = vsel %vm149_vm11, %v141_v58, %v151_v1  ;;  %v172_v3 = vpop.permute.xlu1 %171  ;;  %vm318_vm11 = vcmask 1047558   ;;  %v1364_v1 = vld [vmem:[%s1594_s1] sm:$0xf] }
  0x99   :  { %159 = vst [vmem:[#allocation2 + $0x50] sm:$0x33] %v152_v2  ;;  %v178_v5 = vrot.slane %v172_v3, 4  ;;  %191 = vst.msk [vmem:[#allocation2 + $0x58] sm:$0xc] %vm86_vm5, %v172_v3  ;;  %vm279_vm5 = vcmask 1047559  }
  0x9a   :  { %v174_v6 = vpop.permute.xlu0 %173 }
  0x9b   :  { %v181_v7 = vsel %vm40_vm2, %v177_v4, %v178_v5  ;;  %v179_v13 = vrot.slane %v174_v6, 4  ;;  %v1053_v4 = vmov 0.0  }
  0x9c   :  { %v183_v8 = vsel %vm182_vm12, %v170_v0, %v181_v7  ;;  %v176_v9 = vpop.permute.xlu1 %175  ;;  %v477_v11 = vld [vmem:[#allocation2 + $0x3c] sm:$0xff] }
  0x9d   :  { %v1015_v12 = vld [vmem:[#allocation2 + $0x2c] ss:$20 sps:$4 sm:$0xff]   ;;  %190 = vst [vmem:[#allocation2 + $0x50] sm:$0xcc] %v183_v8  ;;  %v180_v14 = vrot.slane %v176_v9, 4  ;;  %v915_v15 = vcombine.low %v474_v10, %v477_v11 }
  0x9e   :  { %193 = vst.msk [vmem:[#allocation2 + $0x6c] sm:$0x1] %vm89_vm7, %v176_v9  ;;  %v201_v16 = vpop.permute.xlu0 %200  ;;  %608 = vmatprep.subr.bf16.mxu0 %v1015_v12  ;;  %vm269_vm7 = vcmask 252928  }
  0x9f   :  { %v184_v17 = vsel %vm40_vm2, %v179_v13, %v180_v14  ;;  %609 = vmatpush1.bf16.msra.mxu0 %v915_v15  ;;  %v204_v20 = vrot.slane %v201_v16, 4 }
  0xa0   :  { %v185_v18 = vsel %vm182_vm12, %v174_v6, %v184_v17  ;;  %v203_v19 = vpop.permute.xlu1 %202 }
  0xa1   :  { %192 = vst [vmem:[#allocation2 + $0x64] sm:$0x11] %v185_v18  ;;  %v205_v21 = vrot.slane %v203_v19, 4  ;;  %212 = vst.msk [vmem:[#allocation2 + $0x6c] sm:$0xe] %vm109_vm8, %v203_v19  ;;  %vm284_vm8 = vcmask 1041664  }
  0xa2   :  { %v218_v22 = vpop.permute.xlu0 %217  ;;  %vm1301_vm12 = vmor %vm285_vm9, %vm284_vm8  ;;  %vm340_vm9 = vcmask 113664  }
  0xa3   :  { %v206_v23 = vsel %vm40_vm2, %v204_v20, %v205_v21  ;;  %v221_v26 = vrot.slane %v218_v22, 4  ;;  %vm1328_vm8 = vmor %vm324_vm15, %vm323_vm14  ;;  %vm1597_vm14 = vcmask 105472   ;;  %vm385_vm15 = vcmask 97280  }
  0xa4   :  { %v208_v24 = vsel %vm207_vm13, %v201_v16, %v206_v23  ;;  %v220_v25 = vpop.permute.xlu1 %219  ;;  %vm308_vm13 = vcmask 244736   ;;  %v480_v42 = vld [vmem:[#allocation2 + $0x50] sm:$0xff] }
  0xa5   :  { %211 = vst [vmem:[#allocation2 + $0x64] sm:$0xee] %v208_v24  ;;  %v222_v27 = vrot.slane %v220_v25, 4  ;;  %229 = vst.msk [vmem:[#allocation2 + $0x80] sm:$0x7] %vm18_vm0, %v220_v25 }
  0xa6   :  { %v1274_v28 = vpop.permute.xlu0 %235  ;;  %vm1288_vm0 = vmor %vm279_vm5, %vm278_vm4  ;;  %vm345_vm4 = vcmask 1043713   ;;  %vm346_vm5 = vcmask 1047557  }
  0xa7   :  { %v223_v29 = vsel %vm40_vm2, %v221_v26, %v222_v27  ;;  %v239_v31 = vrot.slane %v1274_v28, 4 }
  0xa8   :  { %v225_v32 = vsel %vm224_vm1, %v218_v22, %v223_v29  ;;  %v1282_v33 = vpop.permute.xlu1 %259  ;;  %vm1314_vm1 = vmor %vm318_vm11, %vm317_vm10  ;;  %vm1596_vm10 = vcmask 1042432  }
  0xa9   :  { %228 = vst [vmem:[#allocation2 + $0x78] sm:$0x77] %v225_v32  ;;  %v241_v34 = vsel %vm240_vm3, %v239_v31, %v1274_v28  ;;  %v267_v36 = vrot.slane %v1282_v33, 4  ;;  %vm1341_vm11 = vmor %vm346_vm5, %vm345_vm4  ;;  %vm1598_vm4 = vcmask 441344   ;;  %vm249_vm5 = vcmask 518144  }
  0xaa   :  { %248 = vst.msk [vmem:[#allocation2 + $0x8] sm:$0x77] %vm1277_vm6, %v241_v34  ;;  %v1295_v37 = vpop.permute.xlu0 %263 }
  0xab   :  { %v270_v38 = vsel %vm269_vm7, %v267_v36, %v1282_v33  ;;  %v268_v40 = vrot.slane %v1295_v37, 4 }
  0xac   :  { %281 = vst.msk [vmem:[#allocation2 + $0x8] sm:$0x88] %vm1288_vm0, %v270_v38  ;;  %v1308_v41 = vpop.permute.xlu1 %298  ;;  %v483_v43 = vld [vmem:[#allocation2 + $0x64] sm:$0xff] }
  0xad   :  { %v1017_v44 = vld [vmem:[#allocation2 + $0x54] ss:$20 sps:$4 sm:$0xff]   ;;  %v272_v45 = vsel %vm269_vm7, %v268_v40, %v1295_v37  ;;  %v306_v47 = vrot.slane %v1308_v41, 4  ;;  %v920_v48 = vcombine.low %v480_v42, %v483_v43 }
  0xae   :  { %287 = vst.msk [vmem:[#allocation2 + $0x1c] sm:$0x33] %vm1301_vm12, %v272_v45  ;;  %v1321_v49 = vpop.permute.xlu0 %302  ;;  %610 = vmatprep.subr.bf16.mxu0 %v1017_v44 }
  0xaf   :  { %v309_v50 = vsel %vm308_vm13, %v306_v47, %v1308_v41  ;;  %v307_v52 = vrot.slane %v1321_v49, 4  ;;  %611 = vmatpush1.bf16.msra.mxu0 %v920_v48 }
  0xb0   :  { %320 = vst.msk [vmem:[#allocation2 + $0x1c] sm:$0xcc] %vm1314_vm1, %v309_v50  ;;  %v1335_v53 = vpop.permute.xlu1 %335  ;;  %v486_v54 = vld [vmem:[#allocation2 + $0x78] sm:$0x77] }
  0xb1   :  { %v311_v55 = vsel %vm308_vm13, %v307_v52, %v1321_v49  ;;  %v339_v57 = vrot.slane %v1335_v53, 4  ;;  %v926_v58 = vcombine.high %v486_v54, %v486_v54  ;;  %v925_v59 = vcombine.low %v486_v54, %v486_v54 }
  0xb2   :  { %326 = vst.msk [vmem:[#allocation2 + $0x30] sm:$0x11] %vm1328_vm8, %v311_v55  ;;  %v1348_v60 = vpop.permute.xlu0 %355 }
  0xb3   :  { %v341_v61 = vsel %vm340_vm9, %v339_v57, %v1335_v53  ;;  %v359_v62 = vrot.slane %v1348_v60, 4  ;;  %930 = vmatprep.subr.msk.bf16.mxu0 %vm1596_vm10, %v926_v58  ;;  %v592_v63 = vsel %vm1596_vm10, %v925_v59, 0  ;;  %vm282_vm10 = vcmask 519171  }
  0xb4   :  { %348 = vst.msk [vmem:[#allocation2 + $0x30] sm:$0xee] %vm1341_vm11, %v341_v61  ;;  %v1359_v0 = vpop.permute.xlu1 %375  ;;  %613 = vmatpush1.bf16.msra.mxu0 %v592_v63 }
  0xb5   :  { %v361_v2 = vsel %vm1597_vm14, %v359_v62, %v1348_v60  ;;  %v383_v3 = vrot.slane %v1359_v0, 4  ;;  %956 = vmatprep.subr.bf16.mxu0 %v1053_v4  ;;  %vm1054_vm14 = vmmov 0  }
  0xb6   :  { %365 = vst.msk [vmem:[#allocation2 + $0x44] sm:$0x77] %vm1277_vm6, %v361_v2  ;;  %v238_v5 = vpop.permute.xlu0 %237 }
  0xb7   :  { %v386_v6 = vsel %vm385_vm15, %v383_v3, %v1359_v0  ;;  %v242_v7 = vsel %vm240_vm3, %v239_v31, %v238_v5  ;;  %v1020_v8 = vld [vmem:[#allocation2 + $0xc] ss:$20 sps:$4 sm:$0xff]   ;;  %v1022_v9 = vld [vmem:[#allocation2 + $0x8] ss:$20 sps:$4 sm:$0xff]   ;;  %931 = vmatmul.mubr.msk.bf16.vlgmr.msra.gmra.mrb[0].mxu0 %vm1598_vm4, %v1364_v1  ;;  %vm288_vm3 = vcmask 517120   ;;  %vm349_vm4 = vcmask 519169  }
  0xb8   :  { %394 = vst.msk [vmem:[#allocation2 + $0x44] sm:$0x88] %vm1288_vm0, %v386_v6  ;;  %v262_v10 = vpop.permute.xlu1 %261  ;;  %964 = vmatprep.mubr.msk.bf16.mxu0 %vm1054_vm14, %v1053_v4  ;;  %647 = vmatprep.subr.bf16.mxu1 %v1020_v8  ;;  %vm321_vm0 = vcmask 519170   ;;  %vm419_vm14 = vcmask 1014784  }
  0xb9   :  { %250 = vst.msk [vmem:[#allocation2 + $0x10] sm:$0x7] %vm249_vm5, %v242_v7  ;;  %v271_v11 = vsel %vm269_vm7, %v267_v36, %v262_v10  ;;  %648 = vmatpush1.bf16.msra.mxu1 %v1022_v9 }
  0xba   :  { %283 = vst.msk [vmem:[#allocation2 + $0x10] sm:$0x8] %vm282_vm10, %v271_v11  ;;  %v266_v12 = vpop.permute.xlu0 %265 }
  0xbb   :  { %v273_v13 = vsel %vm269_vm7, %v268_v40, %v266_v12  ;;  %vm327_vm7 = vcmask 516096  }
  0xbc   :  { %289 = vst.msk [vmem:[#allocation2 + $0x24] sm:$0x3] %vm288_vm3, %v273_v13  ;;  %v301_v14 = vpop.permute.xlu1 %300 }
  0xbd   :  { %v310_v15 = vsel %vm308_vm13, %v306_v47, %v301_v14 }
  0xbe   :  { %322 = vst.msk [vmem:[#allocation2 + $0x24] sm:$0xc] %vm321_vm0, %v310_v15  ;;  %v407_v16 = vpop.permute.xlu0 %406 }
  0xbf   :  { %v1023_v17 = vld [vmem:[#allocation2 + $0x34] ss:$20 sps:$4 sm:$0xff]   ;;  %v1025_v18 = vld [vmem:[#allocation2 + $0x30] ss:$20 sps:$4 sm:$0xff]   ;;  %v414_v20 = vrot.slane %v407_v16, 4 }
  0xc0   :  { %v409_v19 = vpop.permute.xlu1 %408  ;;  %649 = vmatprep.subr.bf16.mxu1 %v1023_v17 }
  0xc1   :  { %v415_v21 = vrot.slane %v409_v19, 4  ;;  %428 = vst.msk [vmem:[#allocation2 + $0x60] sm:$0xc] %vm321_vm0, %v409_v19  ;;  %650 = vmatpush1.bf16.msra.mxu1 %v1025_v18  ;;  %vm759_vm0 = vcmask 786048  }
  0xc2   :  { %v411_v22 = vpop.permute.xlu0 %410 }
  0xc3   :  { %v418_v23 = vsel %vm40_vm2, %v414_v20, %v415_v21  ;;  %v416_v26 = vrot.slane %v411_v22, 4 }
  0xc4   :  { %v420_v24 = vsel %vm419_vm14, %v407_v16, %v418_v23  ;;  %v413_v25 = vpop.permute.xlu1 %412 }
  0xc5   :  { %427 = vst.msk [vmem:[#allocation2 + $0x58] sm:$0xcc] %vm1314_vm1, %v420_v24  ;;  %v417_v27 = vrot.slane %v413_v25, 4  ;;  %v1026_v28 = vld [vmem:[#allocation2 + $0x10] ss:$20 sps:$4 sm:$0xff]   ;;  %vm444_vm1 = vcmask 1006592  }
  0xc6   :  { %430 = vst.msk [vmem:[#allocation2 + $0x74] sm:$0x1] %vm327_vm7, %v413_v25  ;;  %v438_v29 = vpop.permute.xlu0 %437  ;;  %957 = vmatpush3.bf16.msra.mxu0 %v1026_v28 }
  0xc7   :  { %v421_v31 = vsel %vm40_vm2, %v416_v26, %v417_v27  ;;  %958 = vmatprep.subr.bf16.mxu0 %v1053_v4  ;;  %v441_v34 = vrot.slane %v438_v29, 4 }
  0xc8   :  { %v422_v32 = vsel %vm419_vm14, %v411_v22, %v421_v31  ;;  %v440_v33 = vpop.permute.xlu1 %439  ;;  %vm839_vm14 = vcmask 703488  }
  0xc9   :  { %429 = vst.msk [vmem:[#allocation2 + $0x6c] sm:$0x11] %vm1328_vm8, %v422_v32  ;;  %v442_v35 = vrot.slane %v440_v33, 4  ;;  %vm1611_vm8 = vcmask 105472  }
  0xca   :  { %449 = vst.msk [vmem:[#allocation2 + $0x74] sm:$0xe] %vm349_vm4, %v440_v33  ;;  %v380_v36 = vpop.permute.xlu0 %379 }
  0xcb   :  { %v443_v37 = vsel %vm40_vm2, %v441_v34, %v442_v35  ;;  %v384_v38 = vrot.slane %v380_v36, 4 }
  0xcc   :  { %v445_v40 = vsel %vm444_vm1, %v438_v29, %v443_v37  ;;  %v305_v41 = vpop.permute.xlu1 %304  ;;  %vm805_vm1 = vcmask 818176  }
  0xcd   :  { %448 = vst.msk [vmem:[#allocation2 + $0x6c] sm:$0xee] %vm1341_vm11, %v445_v40  ;;  %v388_v42 = vsel %vm385_vm15, %v384_v38, %v380_v36  ;;  %v312_v43 = vsel %vm308_vm13, %v307_v52, %v305_v41  ;;  %vm733_vm11 = vcmask 130048  }
  0xce   :  { %396 = vst.msk [vmem:[#allocation2 + $0x58] sm:$0x33] %vm1301_vm12, %v388_v42  ;;  %v338_v44 = vpop.permute.xlu0 %337  ;;  %vm461_vm12 = vcmask 998400  }
  0xcf   :  { %328 = vst.msk [vmem:[#allocation2 + $0x38] sm:$0x1] %vm327_vm7, %v312_v43  ;;  %v342_v45 = vsel %vm340_vm9, %v339_v57, %v338_v44  ;;  %vm764_vm7 = vcmask 917248  }
  0xd0   :  { %350 = vst.msk [vmem:[#allocation2 + $0x38] sm:$0xe] %vm349_vm4, %v342_v45  ;;  %v358_v46 = vpop.permute.xlu1 %357  ;;  %vm744_vm4 = vcmask 392448  }
  0xd1   :  { %v362_v47 = vsel %vm1611_vm8, %v359_v62, %v358_v46  ;;  %vm872_vm8 = vcmask 588800  }
  0xd2   :  { %366 = vst.msk [vmem:[#allocation2 + $0x4c] sm:$0x7] %vm249_vm5, %v362_v47  ;;  %v378_v48 = vpop.permute.xlu0 %377 }
  0xd3   :  { %v387_v39 = vsel %vm385_vm15, %v383_v3, %v378_v48 }
  0xd4   :  { %395 = vst.msk [vmem:[#allocation2 + $0x4c] sm:$0x8] %vm282_vm10, %v387_v39  ;;  %v455_v49 = vpop.permute.xlu1 %454 }
  0xd5   :  { %v458_v50 = vrot.slane %v455_v49, 4  ;;  %v1027_v51 = vld [vmem:[#allocation2 + $0x5c] ss:$20 sps:$4 sm:$0xff]   ;;  %v1029_v52 = vld [vmem:[#allocation2 + $0x58] ss:$20 sps:$4 sm:$0xff]  }
  0xd6   :  { %v457_v53 = vpop.permute.xlu0 %456  ;;  %651 = vmatprep.subr.bf16.mxu1 %v1027_v51 }
  0xd7   :  { %v459_v54 = vrot.slane %v457_v53, 4  ;;  %466 = vst.msk [vmem:[#allocation2 + $0x88] sm:$0x7] %vm249_vm5, %v457_v53  ;;  %652 = vmatpush1.bf16.msra.mxu1 %v1029_v52  ;;  %vm749_vm5 = vcmask 523648  }
  0xd8   :  { %v382_v55 = vpop.permute.xlu1 %381 }
  0xd9   :  { %v460_v56 = vsel %vm40_vm2, %v458_v50, %v459_v54  ;;  %v389_v57 = vsel %vm385_vm15, %v384_v38, %v382_v55  ;;  %vm1612_vm2 = vcmask 1042432   ;;  %vm739_vm15 = vcmask 261248  }
  0xda   :  { %v462_v58 = vsel %vm461_vm12, %v455_v49, %v460_v56  ;;  %397 = vst.msk [vmem:[#allocation2 + $0x60] sm:$0x3] %vm288_vm3, %v389_v57  ;;  %vm1613_vm13 = vmmov %vm1612_vm2  ;;  %vm754_vm3 = vcmask 654848   ;;  %vm774_vm12 = vcmask 1048448  }
  0xdb   :  { %465 = vst.msk [vmem:[#allocation2 + $0x80] sm:$0x77] %vm1277_vm6, %v462_v58  ;;  %v1030_v59 = vld [vmem:[#allocation2 + $0x38] ss:$20 sps:$4 sm:$0xff]   ;;  %vm1614_vm9 = vmmov %vm1612_vm2  ;;  %vm1615_vm6 = vcmask 441344  }
  0xdc   :  { %959 = vmatpush3.bf16.msra.mxu0 %v1030_v59  ;;  %vm1616_vm10 = vmmov %vm1615_vm6 }
  0xdd   :  { %960 = vmatprep.subr.bf16.mxu0 %v1053_v4 }
  0xde   :  { %v1034_v62 = vld [vmem:[#allocation2 + $0x88] ss:$0 sps:$4 sm:$0x77]  }
  0xdf   :  { %v604_v30 = vsel %vm1614_vm9, %v1034_v62, 0 }
  0xe1   :  { %v1031_v60 = vld [vmem:[#allocation2 + $0x60] ss:$20 sps:$4 sm:$0xff]  }
  0xe2   :  { %v487_v61 = vld [vmem:[#allocation2 + $0x80] sm:$0x77]  ;;  %961 = vmatpush3.bf16.msra.mxu0 %v1031_v60 }
  0xe3   :  { %v928_v63 = vcombine.high %v487_v61, %v487_v61  ;;  %v927_v0 = vcombine.low %v487_v61, %v487_v61  ;;  %962 = vmatprep.subr.bf16.mxu0 %v1053_v4 }
  0xe5   :  { %932 = vmatprep.subr.msk.bf16.mxu1 %vm1612_vm2, %v928_v63  ;;  %v598_v2 = vsel %vm1613_vm13, %v927_v0, 0  ;;  %vm771_vm2 = vcmask 932864  }
  0xe6   :  { %654 = vmatpush1.bf16.msra.mxu1 %v598_v2  ;;  %963 = vmatpush3.bf16.msra.mxu0 %v604_v30 }
  0xe7   :  { %v1446_v3 = vpop.permute.xlu0 %492 }
  0xe9   :  { %933 = vmatmul.mubr.msk.bf16.vlgmr.msra.gmra.mrb[0].mxu1 %vm1615_vm6, %v1364_v1  ;;  %965 = vmatmul.mubr.msk.bf16.vlgmr.msra.gmra.mrb[4].mxu0 %vm1616_vm10, %v1364_v1 }
 0x18a   :  { %v640_v5 = vpop.f32.mrb[0].mxu0 }
 0x18b   :  { %v642_v6 = vpop.f32.mrb[1].mxu0  ;;  %v641_v4 = vadd.f32 %v640_v5, %v1446_v3 }
 0x18c   :  { %v644_v7 = vpop.f32.mrb[2].mxu0  ;;  %v643_v21 = vadd.f32 %v642_v6, %v1446_v3 }
 0x18d   :  { %v728_v8 = vmax.f32 %v641_v4, 0.0  ;;  %v645_v9 = vpop.f32.mrb[3].mxu0 }
 0x18e   :  { %v729_v22 = vmax.f32 %v643_v21, 0.0 }
 0x18f   :  { %734 = vst.msk [vmem:[%s1595_s3] sm:$0xff] %vm733_vm11, %v728_v8 }
 0x1bc   :  { %v681_v10 = vpop.f32.mrb[0].mxu1  ;;  %v722_v1 = vpop.f32.mrb[4].mxu0 }
 0x1bd   :  { %v682_v11 = vadd.f32 %v681_v10, %v1446_v3  ;;  %v683_v12 = vpop.f32.mrb[1].mxu1  ;;  %v966_v14 = vpop.f32.mrb[5].mxu0  ;;  %v723_v23 = vadd.f32 %v722_v1, %v1446_v3 }
 0x1be   :  { %v685_v13 = vpop.f32.mrb[2].mxu1  ;;  %v725_v17 = vpop.f32.mrb[6].mxu0  ;;  %v684_v19 = vadd.f32 %v683_v12, %v1446_v3 }
 0x1bf   :  { %v730_v15 = vmax.f32 %v682_v11, 0.0  ;;  %v686_v16 = vpop.f32.mrb[3].mxu1  ;;  %v967_v18 = vpop.f32.mrb[7].mxu0  ;;  %v732_v24 = vmax.f32 %v723_v23, 0.0 }
 0x1c0   :  { %v731_v20 = vmax.f32 %v684_v19, 0.0 }
 0x1c1   :  { %818 = vrot.lane.b32.xlu1 %v730_v15, %s1055_s8  ;;  %813 = vrot.lane.b32.xlu0 %v730_v15, %s1056_s9 }
 0x1c5   :  { %826 = vrot.lane.b32.xlu1 %v730_v15, %s1042_s5  ;;  %822 = vrot.lane.b32.xlu0 %v730_v15, %s1040_s16  ;;  %s1061_s5 = smov 78   ;;  %s1062_s16 = smov 74  }
 0x1c9   :  { %830 = vrot.lane.b32.xlu1 %v730_v15, %s1057_s13  ;;  %835 = vrot.lane.b32.xlu0 %v730_v15, %s1058_s14 }
 0x1cd   :  { %803 = vrot.lane.b32.xlu1 %v730_v15, %s1059_s17  ;;  %809 = vrot.lane.b32.xlu0 %v730_v15, %s1060_s18 }
 0x1d1   :  { %746 = vrot.lane.b32.xlu0 %v728_v8, %s1052_s15  ;;  %736 = vrot.lane.b32.xlu1 %v728_v8, %s1036_s21  ;;  %s1068_s21 = smov 84   ;;  %s1077_s15 = smov 68  }
 0x1d5   :  { %855 = vrot.lane.b32.xlu0 %v731_v20, %s1061_s5  ;;  %741 = vrot.lane.b32.xlu1 %v728_v8, %s1050_s10  ;;  %s1070_s10 = smov 106  }
 0x1d9   :  { %863 = vrot.lane.b32.xlu0 %v731_v20, %s1062_s16  ;;  %851 = vrot.lane.b32.xlu1 %v731_v20, %s1063_s12 }
 0x1dd   :  { %756 = vrot.lane.b32.xlu0 %v728_v8, %s1064_s19  ;;  %859 = vrot.lane.b32.xlu1 %v731_v20, %s1065_s20 }
 0x1e1   :  { %767 = vrot.lane.b32.xlu0 %v728_v8, %s1066_s22  ;;  %868 = vrot.lane.b32.xlu1 %v731_v20, %s1067_s23 }
 0x1e5   :  { %843 = vrot.lane.b32.xlu0 %v731_v20, %s1068_s21  ;;  %751 = vrot.lane.b32.xlu1 %v728_v8, %s1069_s27 }
 0x1e9   :  { %780 = vrot.lane.b32.xlu0 %v729_v22, %s1037_s26  ;;  %837 = vrot.lane.b32.xlu1 %v731_v20, %s1058_s14  ;;  %s1075_s26 = smov 70  }
 0x1ed   :  { %788 = vrot.lane.b32.xlu0 %v729_v22, %s1070_s10  ;;  %761 = vrot.lane.b32.xlu1 %v728_v8, %s1071_s28 }
 0x1f1   :  { %792 = vrot.lane.b32.xlu0 %v729_v22, %s1072_s30  ;;  %776 = vrot.lane.b32.xlu1 %v729_v22, %s1073_s4 }
 0x1f5   :  { %801 = vrot.lane.b32.xlu0 %v729_v22, %s1059_s17  ;;  %784 = vrot.lane.b32.xlu1 %v729_v22, %s1039_s11 }
 0x1f9   :  { %870 = vrot.lane.b32.xlu0 %v732_v24, %s1067_s23  ;;  %796 = vrot.lane.b32.xlu1 %v729_v22, %s1074_s6 }
 0x1fd   :  { %876 = vrot.lane.b32.xlu0 %v732_v24, %s1075_s26  ;;  %769 = vrot.lane.b32.xlu1 %v729_v22, %s1066_s22 }
 0x201   :  { %884 = vrot.lane.b32.xlu0 %v732_v24, %s1076_s7  ;;  %880 = vrot.lane.b32.xlu1 %v732_v24, %s1077_s15 }
 0x205   :  { %847 = vrot.lane.b32.xlu1 %v731_v20, %s1078_s24 }
 0x233   :  { %v819_v25 = vpop.permute.xlu1 %818  ;;  %v814_v26 = vpop.permute.xlu0 %813 }
 0x234   :  { %935 = vst.msk [vmem:[%s1595_s3 + $0x10] sm:$0xff] %vm733_vm11, %v814_v26 }
 0x235   :  { %936 = vst.msk [vmem:[%s1595_s3 + $0x10] sm:$0xff] %vm739_vm15, %v819_v25 }
 0x237   :  { %v827_v27 = vpop.permute.xlu1 %826  ;;  %v823_v28 = vpop.permute.xlu0 %822 }
 0x238   :  { %937 = vst.msk [vmem:[%s1595_s3 + $0x10] sm:$0xff] %vm744_vm4, %v823_v28 }
 0x239   :  { %938 = vst.msk [vmem:[%s1595_s3 + $0x10] sm:$0xff] %vm749_vm5, %v827_v27 }
 0x23b   :  { %v831_v29 = vpop.permute.xlu1 %830  ;;  %v836_v31 = vpop.permute.xlu0 %835 }
 0x23c   :  { %939 = vst.msk [vmem:[%s1595_s3 + $0x10] sm:$0xff] %vm754_vm3, %v831_v29 }
 0x23f   :  { %v804_v32 = vpop.permute.xlu1 %803  ;;  %v810_v33 = vpop.permute.xlu0 %809 }
 0x243   :  { %v747_v34 = vpop.permute.xlu0 %746  ;;  %v737_v35 = vpop.permute.xlu1 %736 }
 0x244   :  { %740 = vst.msk [vmem:[%s1595_s3] sm:$0xff] %vm739_vm15, %v737_v35 }
 0x247   :  { %v856_v36 = vpop.permute.xlu0 %855  ;;  %v742_v37 = vpop.permute.xlu1 %741 }
 0x248   :  { %745 = vst.msk [vmem:[%s1595_s3] sm:$0xff] %vm744_vm4, %v742_v37 }
 0x249   :  { %750 = vst.msk [vmem:[%s1595_s3] sm:$0xff] %vm749_vm5, %v747_v34 }
 0x24b   :  { %v864_v38 = vpop.permute.xlu0 %863  ;;  %v852_v40 = vpop.permute.xlu1 %851 }
 0x24c   :  { %943 = vst.msk [vmem:[%s1595_s3 + $0x18] sm:$0xff] %vm733_vm11, %v852_v40 }
 0x24d   :  { %944 = vst.msk [vmem:[%s1595_s3 + $0x18] sm:$0xff] %vm739_vm15, %v856_v36 }
 0x24f   :  { %v757_v41 = vpop.permute.xlu0 %756  ;;  %v860_v42 = vpop.permute.xlu1 %859 }
 0x250   :  { %945 = vst.msk [vmem:[%s1595_s3 + $0x18] sm:$0xff] %vm744_vm4, %v860_v42 }
 0x251   :  { %946 = vst.msk [vmem:[%s1595_s3 + $0x18] sm:$0xff] %vm749_vm5, %v864_v38 }
 0x253   :  { %v768_v43 = vpop.permute.xlu0 %767  ;;  %v869_v44 = vpop.permute.xlu1 %868 }
 0x257   :  { %v844_v45 = vpop.permute.xlu0 %843  ;;  %v752_v46 = vpop.permute.xlu1 %751 }
 0x258   :  { %755 = vst.msk [vmem:[%s1595_s3] sm:$0xff] %vm754_vm3, %v752_v46 }
 0x259   :  { %760 = vst.msk [vmem:[%s1595_s3] sm:$0xff] %vm759_vm0, %v757_v41 }
 0x25b   :  { %v781_v47 = vpop.permute.xlu0 %780  ;;  %v838_v48 = vpop.permute.xlu1 %837 }
 0x25c   :  { %v840_v39 = vsel %vm839_vm14, %v836_v31, %v838_v48 }
 0x25d   :  { %940 = vst.msk [vmem:[%s1595_s3 + $0x10] sm:$0xff] %vm759_vm0, %v840_v39 }
 0x25e   :  { %941 = vst.msk [vmem:[%s1595_s3 + $0x10] sm:$0xff] %vm764_vm7, %v844_v45 }
 0x25f   :  { %v789_v49 = vpop.permute.xlu0 %788  ;;  %v762_v50 = vpop.permute.xlu1 %761 }
 0x260   :  { %765 = vst.msk [vmem:[%s1595_s3] sm:$0xff] %vm764_vm7, %v762_v50 }
 0x263   :  { %v793_v51 = vpop.permute.xlu0 %792  ;;  %v777_v52 = vpop.permute.xlu1 %776 }
 0x264   :  { %779 = vst.msk [vmem:[%s1595_s3 + $0x8] sm:$0xff] %vm733_vm11, %v777_v52 }
 0x265   :  { %783 = vst.msk [vmem:[%s1595_s3 + $0x8] sm:$0xff] %vm739_vm15, %v781_v47 }
 0x267   :  { %v802_v53 = vpop.permute.xlu0 %801  ;;  %v785_v54 = vpop.permute.xlu1 %784 }
 0x268   :  { %787 = vst.msk [vmem:[%s1595_s3 + $0x8] sm:$0xff] %vm744_vm4, %v785_v54  ;;  %v806_v57 = vsel %vm805_vm1, %v802_v53, %v804_v32 }
 0x269   :  { %791 = vst.msk [vmem:[%s1595_s3 + $0x8] sm:$0xff] %vm749_vm5, %v789_v49 }
 0x26a   :  { %795 = vst.msk [vmem:[%s1595_s3 + $0x8] sm:$0xff] %vm754_vm3, %v793_v51 }
 0x26b   :  { %v871_v55 = vpop.permute.xlu0 %870  ;;  %v797_v56 = vpop.permute.xlu1 %796 }
 0x26c   :  { %v873_v58 = vsel %vm872_vm8, %v869_v44, %v871_v55  ;;  %799 = vst.msk [vmem:[%s1595_s3 + $0x8] sm:$0xff] %vm759_vm0, %v797_v56 }
 0x26d   :  { %947 = vst.msk [vmem:[%s1595_s3 + $0x18] sm:$0xff] %vm754_vm3, %v873_v58 }
 0x26e   :  { %808 = vst.msk [vmem:[%s1595_s3 + $0x8] sm:$0xff] %vm764_vm7, %v806_v57 }
 0x26f   :  { %812 = vst.msk [vmem:[%s1595_s3 + $0x8] sm:$0xff] %vm774_vm12, %v810_v33  ;;  %v877_v59 = vpop.permute.xlu0 %876  ;;  %v770_v60 = vpop.permute.xlu1 %769 }
 0x270   :  { %948 = vst.msk [vmem:[%s1595_s3 + $0x18] sm:$0xff] %vm759_vm0, %v877_v59  ;;  %v772_v61 = vsel %vm771_vm2, %v768_v43, %v770_v60 }
 0x271   :  { %775 = vst.msk [vmem:[%s1595_s3] sm:$0xff] %vm774_vm12, %v772_v61 }
 0x273   :  { %v885_v62 = vpop.permute.xlu0 %884  ;;  %v881_v63 = vpop.permute.xlu1 %880 }
 0x274   :  { %949 = vst.msk [vmem:[%s1595_s3 + $0x18] sm:$0xff] %vm764_vm7, %v881_v63 }
 0x275   :  { %950 = vst.msk [vmem:[%s1595_s3 + $0x18] sm:$0xff] %vm774_vm12, %v885_v62 }
 0x277   :  { %v848_v0 = vpop.permute.xlu1 %847 }
 0x278   :  { %942 = vst.msk [vmem:[%s1595_s3 + $0x10] sm:$0xff] %vm774_vm12, %v848_v0 }

</bundles_post_ra>
